<compile_context>
chip_gen: v5e
topology: v5e:2x2
jax: 0.10.0
libtpu: 0.0.40
codegen_flags: <defaults>
</compile_context>

<pallas_src>
import functools

import jax
import jax.numpy as jnp
from jax import lax
from jax.experimental import pallas as pl
from jax.experimental.pallas import tpu as pltpu


# ----------------------------------------------------------------------------
# helpers shared by the Pallas kernel and the pure-JAX reference
# ----------------------------------------------------------------------------

def how_many_groups(in_c):
    # TODO(synk): how_many_groups() is not given in the spec; assume the common
    # "2 channels per group" heuristic (largest divisor of in_c <= in_c // 2).
    g = max(1, in_c // 2)
    while in_c % g != 0:
        g -= 1
    return g


def _gelu_tanh(x):
    # tanh-approximate GELU (mul/add/tanh only -> clean VPU/EUP lowering).
    # TODO(synk): PyTorch F.gelu defaults to the exact erf form; the tanh
    # approximation (<~3e-3 abs diff) is used consistently in kernel and ref.
    c = 0.7978845608028654  # sqrt(2 / pi)
    return 0.5 * x * (1.0 + jnp.tanh(c * (x + 0.044715 * x * x * x)))


# ----------------------------------------------------------------------------
# fused ResChain Pallas kernel
# ----------------------------------------------------------------------------

def _reschain_kernel(x_ref, wconv_ref, bconv_ref, gamma_ref, beta_ref,
                     o_ref, xpad_ref, *, H, W, num_layers, n_conv, groups, eps):
    # x_ref     : (1, C, S)         one batch element, channels-first, S = H*W
    # wconv_ref : (n_conv, C, 9*C)  im2col weight matrices, rows ordered (dy,dx,ci)
    # bconv_ref : (n_conv, C, 1)
    # gamma_ref : (num_layers, C, 1)  GroupNorm affine
    # beta_ref  : (num_layers, C, 1)
    # o_ref     : (1, C, S)
    # xpad_ref  : (C, S + 2*W + 2)  VMEM scratch: flat zero-padded line buffer
    C = x_ref.shape[1]
    S = H * W
    PAD = W + 1                      # flat left/right padding of the scratch

    # Horizontal-boundary masks for the dx=0 / dx=2 taps (built once per step).
    wcoord = lax.broadcasted_iota(jnp.int32, (1, S), 1) % W
    mask_l = wcoord >= 1             # source column w-1 is in range
    mask_r = wcoord <= W - 2         # source column w+1 is in range

    # Zero the padded line buffer once; pad regions are never overwritten.
    xpad_ref[...] = jnp.zeros(xpad_ref.shape, xpad_ref.dtype)

    def conv3x3(act, wmat, bias):
        # act (C, S) -> (C, S); one MXU matmul over all 9*C im2col rows.
        xpad_ref[:, PAD:PAD + S] = act
        cols = []
        for dy in range(3):
            for dx in range(3):
                d = (dy - 1) * W + (dx - 1)            # flat-index tap shift
                c = xpad_ref[:, PAD + d:PAD + d + S]   # static lane-offset slice
                if dx == 0:
                    c = jnp.where(mask_l, c, 0.0)
                elif dx == 2:
                    c = jnp.where(mask_r, c, 0.0)
                cols.append(c)
        patches = jnp.concatenate(cols, axis=0)        # (9*C, S)
        return jnp.dot(wmat, patches,
                       preferred_element_type=jnp.float32) + bias

    def group_norm(y, gamma, beta):
        cg = C // groups
        parts = []
        for g in range(groups):
            yg = y[g * cg:(g + 1) * cg, :]             # (cg, S)
            s1 = jnp.sum(jnp.sum(yg, axis=1, keepdims=True),
                         axis=0, keepdims=True)        # (1, 1)
            m = s1 / (cg * S)
            d2 = (yg - m) * (yg - m)
            v = jnp.sum(jnp.sum(d2, axis=1, keepdims=True),
                        axis=0, keepdims=True) / (cg * S)
            parts.append((yg - m) * lax.rsqrt(v + eps))
        yn = jnp.concatenate(parts, axis=0)            # (C, S)
        return yn * gamma + beta

    act = x_ref[0]                                     # (C, S), f32
    for i in range(num_layers):                        # ResBlock i
        y = conv3x3(act, wconv_ref[i], bconv_ref[i])
        y = group_norm(y, gamma_ref[i], beta_ref[i])
        act = _gelu_tanh(y + act)
    if n_conv > num_layers:                            # final block's conv_2
        act = conv3x3(act, wconv_ref[num_layers], bconv_ref[num_layers])
    o_ref[0] = act


def reschain_forward_pallas(x_nchw, params):
    N, C, H, W = x_nchw.shape
    S = H * W
    wmat = params["wmat"]                               # (n_conv, C, 9*C)
    n_conv = wmat.shape[0]
    num_layers = params["gamma"].shape[0]
    bconv = params["b"].reshape(n_conv, C, 1)
    gamma = params["gamma"].reshape(num_layers, C, 1)
    beta = params["beta"].reshape(num_layers, C, 1)

    kern = functools.partial(
        _reschain_kernel, H=H, W=W, num_layers=num_layers, n_conv=n_conv,
        groups=params["groups"], eps=1e-5)

    y = pl.pallas_call(
        kern,
        out_shape=jax.ShapeDtypeStruct((N, C, S), jnp.float32),
        grid=(N,),
        in_specs=[
            pl.BlockSpec((1, C, S), lambda n: (n, 0, 0)),           # activations
            pl.BlockSpec((n_conv, C, 9 * C), lambda n: (0, 0, 0)),  # resident
            pl.BlockSpec((n_conv, C, 1), lambda n: (0, 0, 0)),      # resident
            pl.BlockSpec((num_layers, C, 1), lambda n: (0, 0, 0)),  # resident
            pl.BlockSpec((num_layers, C, 1), lambda n: (0, 0, 0)),  # resident
        ],
        out_specs=pl.BlockSpec((1, C, S), lambda n: (n, 0, 0)),
        scratch_shapes=[pltpu.VMEM((C, S + 2 * W + 2), jnp.float32)],
        compiler_params=pltpu.CompilerParams(
            dimension_semantics=("parallel",)),
    )(x_nchw.reshape(N, C, S).astype(jnp.float32), wmat, bconv, gamma, beta)
    return y.reshape(N, C, H, W)


# ----------------------------------------------------------------------------
# deterministic synthetic parameters + pure-JAX reference (for the sanity check)
# ----------------------------------------------------------------------------

def make_reschain_params(key, in_c, num_layers=2, as_final_block=False):
    """Conv2d: kaiming-normal (fan_in) weights (weights_init_kaiming) + default
    uniform bias; GroupNorm keeps its default affine (gamma=1, beta=0)."""
    n_conv = num_layers + (1 if as_final_block else 0)
    keys = jax.random.split(key, 2 * n_conv)
    fan_in = in_c * 9
    std = (2.0 / fan_in) ** 0.5
    bound = 1.0 / (fan_in ** 0.5)
    ws, bs = [], []
    for i in range(n_conv):
        ws.append(std * jax.random.normal(keys[2 * i], (in_c, in_c, 3, 3),
                                          jnp.float32))
        bs.append(jax.random.uniform(keys[2 * i + 1], (in_c,), jnp.float32,
                                     -bound, bound))
    w_oihw = jnp.stack(ws)                               # (n_conv, C, C, 3, 3)
    # im2col weight matrices, contraction rows ordered (dy, dx, ci)
    wmat = jnp.transpose(w_oihw, (0, 1, 3, 4, 2)).reshape(n_conv, in_c, 9 * in_c)
    return dict(
        w_oihw=w_oihw, wmat=wmat, b=jnp.stack(bs),
        gamma=jnp.ones((num_layers, in_c), jnp.float32),
        beta=jnp.zeros((num_layers, in_c), jnp.float32),
        groups=how_many_groups(in_c))


def reschain_forward_ref(x_nchw, params):
    w, b = params["w_oihw"], params["b"]
    gamma, beta, groups = params["gamma"], params["beta"], params["groups"]
    num_layers, n_conv = gamma.shape[0], w.shape[0]
    eps = 1e-5

    def conv(x, wi, bi):
        y = lax.conv_general_dilated(
            x, wi, window_strides=(1, 1), padding=((1, 1), (1, 1)),
            dimension_numbers=("NCHW", "OIHW", "NCHW"))
        return y + bi.reshape(1, -1, 1, 1)

    def gnorm(x, g, bt):
        N, C, H, W = x.shape
        cg = C // groups
        xg = x.reshape(N, groups, cg * H * W)
        m = jnp.mean(xg, axis=2, keepdims=True)
        v = jnp.mean((xg - m) ** 2, axis=2, keepdims=True)
        xn = ((xg - m) * lax.rsqrt(v + eps)).reshape(N, C, H, W)
        return xn * g.reshape(1, C, 1, 1) + bt.reshape(1, C, 1, 1)

    act = x_nchw
    for i in range(num_layers):
        y = gnorm(conv(act, w[i], b[i]), gamma[i], beta[i])
        act = _gelu_tanh(y + act)
    if n_conv > num_layers:
        act = conv(act, w[num_layers], b[num_layers])
    return act


# ------------------------------------ main ------------------------------------

if __name__ == "__main__":
    key = jax.random.PRNGKey(0)
    k_x, k_p = jax.random.split(key)

    N, C, H, W = 2, 4, 16, 16            # NCHW, as the PyTorch module expects
    NUM_LAYERS = 2
    AS_FINAL_BLOCK = True                # exercises the final block's conv_2
    # TODO(synk): dropout_p > 0 (training-mode Dropout2d) not implemented; with
    # p = 0 (the module default) Dropout2d is the identity, matching this forward.

    x = jax.random.normal(k_x, (N, C, H, W), jnp.float32)
    params = make_reschain_params(k_p, C, num_layers=NUM_LAYERS,
                                  as_final_block=AS_FINAL_BLOCK)

    y = reschain_forward_pallas(x, params)
    jax.block_until_ready(y)

    y_ref = reschain_forward_ref(x, params)
    assert y.shape == (N, C, H, W)
    assert jnp.allclose(y, y_ref, atol=1e-3, rtol=1e-3), \
        float(jnp.max(jnp.abs(y - y_ref)))

    print("KERNEL_OK")
</pallas_src>

<mosaic_0001>
module attributes {stable_mosaic.version = 11 : i64} {
  func.func @_reschain_kernel(%arg0: i32, %arg1: memref<1x4x256xf32, #tpu.memory_space<vmem>>, %arg2: memref<3x4x36xf32, #tpu.memory_space<vmem>>, %arg3: memref<3x4x1xf32, #tpu.memory_space<vmem>>, %arg4: memref<2x4x1xf32, #tpu.memory_space<vmem>>, %arg5: memref<2x4x1xf32, #tpu.memory_space<vmem>>, %arg6: memref<1x4x256xf32, #tpu.memory_space<vmem>>, %arg7: memref<4x290xf32, #tpu.memory_space<vmem>>) attributes {dimension_semantics = [#tpu.dimension_semantics<parallel>], iteration_bounds = array<i64: 2>, scalar_prefetch = 0 : i64, scratch_operands = 1 : i64, tpu.core_type = #tpu.core_type<tc>, window_params = [{transform_indices = @transform_0, window_bounds = array<i64: 1, 4, 256>}, {pipeline_mode = #tpu.pipeline_mode<synchronous>, transform_indices = @transform_1, window_bounds = array<i64: 3, 4, 36>}, {pipeline_mode = #tpu.pipeline_mode<synchronous>, transform_indices = @transform_2, window_bounds = array<i64: 3, 4, 1>}, {pipeline_mode = #tpu.pipeline_mode<synchronous>, transform_indices = @transform_3, window_bounds = array<i64: 2, 4, 1>}, {pipeline_mode = #tpu.pipeline_mode<synchronous>, transform_indices = @transform_4, window_bounds = array<i64: 2, 4, 1>}, {transform_indices = @transform_5, window_bounds = array<i64: 1, 4, 256>}]} {
    %0 = tpu.iota {dimensions = array<i32: 1>} : vector<1x256xi32>
    %c16_i32 = arith.constant 16 : i32
    %c0_i32 = arith.constant 0 : i32
    %1 = arith.cmpi eq, %c16_i32, %c0_i32 : i32
    %c1_i32 = arith.constant 1 : i32
    %2 = arith.select %1, %c1_i32, %c16_i32 : i32
    %3 = vector.broadcast %2 : i32 to vector<1x256xi32>
    %4 = arith.remsi %0, %3 : vector<1x256xi32>
    %c0_i32_0 = arith.constant 0 : i32
    %5 = vector.broadcast %c0_i32_0 : i32 to vector<1x256xi32>
    %6 = arith.cmpi ne, %4, %5 : vector<1x256xi32>
    %c0_i32_1 = arith.constant 0 : i32
    %7 = vector.broadcast %c0_i32_1 : i32 to vector<1x256xi32>
    %8 = arith.cmpi slt, %4, %7 : vector<1x256xi32>
    %c0_i32_2 = arith.constant 0 : i32
    %9 = arith.cmpi slt, %2, %c0_i32_2 : i32
    %10 = vector.broadcast %9 : i1 to vector<1x256xi1>
    %11 = vector.broadcast %10 : vector<1x256xi1> to vector<1x256xi1>
    %12 = arith.xori %8, %11 : vector<1x256xi1>
    %13 = arith.andi %12, %6 : vector<1x256xi1>
    %14 = vector.broadcast %2 : i32 to vector<1x256xi32>
    %15 = arith.addi %4, %14 : vector<1x256xi32>
    %16 = arith.select %13, %15, %4 : vector<1x256xi1>, vector<1x256xi32>
    %c1_i32_3 = arith.constant 1 : i32
    %17 = vector.broadcast %c1_i32_3 : i32 to vector<1x256xi32>
    %18 = arith.cmpi sge, %16, %17 : vector<1x256xi32>
    %c14_i32 = arith.constant 14 : i32
    %19 = vector.broadcast %c14_i32 : i32 to vector<1x256xi32>
    %20 = arith.cmpi sle, %16, %19 : vector<1x256xi32>
    %cst = arith.constant 0.000000e+00 : f32
    %21 = vector.broadcast %cst : f32 to vector<4x290xf32>
    %c0 = arith.constant 0 : index
    %c0_4 = arith.constant 0 : index
    %22 = vector.load %arg7[%c0, %c0_4] : memref<4x290xf32, #tpu.memory_space<vmem>>, vector<4x290xf32>
    tpu.vector_store %arg7[%c0, %c0_4], %21 {strides = array<i32>} : memref<4x290xf32, #tpu.memory_space<vmem>>, vector<4x290xf32>,
    %c0_5 = arith.constant 0 : index
    %c0_6 = arith.constant 0 : index
    %c0_7 = arith.constant 0 : index
    %23 = vector.load %arg1[%c0_5, %c0_6, %c0_7] : memref<1x4x256xf32, #tpu.memory_space<vmem>>, vector<1x4x256xf32>
    %24 = vector.shape_cast %23 : vector<1x4x256xf32> to vector<4x256xf32>
    %c0_8 = arith.constant 0 : index
    %c0_9 = arith.constant 0 : index
    %c0_10 = arith.constant 0 : index
    %25 = vector.load %arg2[%c0_8, %c0_9, %c0_10] : memref<3x4x36xf32, #tpu.memory_space<vmem>>, vector<1x4x36xf32>
    %26 = vector.shape_cast %25 : vector<1x4x36xf32> to vector<4x36xf32>
    %c0_11 = arith.constant 0 : index
    %c0_12 = arith.constant 0 : index
    %c0_13 = arith.constant 0 : index
    %27 = vector.load %arg3[%c0_11, %c0_12, %c0_13] : memref<3x4x1xf32, #tpu.memory_space<vmem>>, vector<1x4x1xf32>
    %28 = vector.shape_cast %27 : vector<1x4x1xf32> to vector<4x1xf32>
    %c0_14 = arith.constant 0 : index
    %c17 = arith.constant 17 : index
    %29 = vector.load %arg7[%c0_14, %c17] : memref<4x290xf32, #tpu.memory_space<vmem>>, vector<4x256xf32>
    tpu.vector_store %arg7[%c0_14, %c17], %24 {strides = array<i32>} : memref<4x290xf32, #tpu.memory_space<vmem>>, vector<4x256xf32>,
    %c0_15 = arith.constant 0 : index
    %c0_16 = arith.constant 0 : index
    %30 = vector.load %arg7[%c0_15, %c0_16] : memref<4x290xf32, #tpu.memory_space<vmem>>, vector<4x256xf32>
    %cst_17 = arith.constant 0.000000e+00 : f32
    %31 = vector.shape_cast %18 : vector<1x256xi1> to vector<1x256xi1>
    %32 = vector.broadcast %31 : vector<1x256xi1> to vector<4x256xi1>
    %33 = vector.broadcast %cst_17 : f32 to vector<4x256xf32>
    %34 = arith.select %32, %30, %33 : vector<4x256xi1>, vector<4x256xf32>
    %c0_18 = arith.constant 0 : index
    %c1 = arith.constant 1 : index
    %35 = vector.load %arg7[%c0_18, %c1] : memref<4x290xf32, #tpu.memory_space<vmem>>, vector<4x256xf32>
    %c0_19 = arith.constant 0 : index
    %c2 = arith.constant 2 : index
    %36 = vector.load %arg7[%c0_19, %c2] : memref<4x290xf32, #tpu.memory_space<vmem>>, vector<4x256xf32>
    %cst_20 = arith.constant 0.000000e+00 : f32
    %37 = vector.shape_cast %20 : vector<1x256xi1> to vector<1x256xi1>
    %38 = vector.broadcast %37 : vector<1x256xi1> to vector<4x256xi1>
    %39 = vector.broadcast %cst_20 : f32 to vector<4x256xf32>
    %40 = arith.select %38, %36, %39 : vector<4x256xi1>, vector<4x256xf32>
    %c0_21 = arith.constant 0 : index
    %c16 = arith.constant 16 : index
    %41 = vector.load %arg7[%c0_21, %c16] : memref<4x290xf32, #tpu.memory_space<vmem>>, vector<4x256xf32>
    %cst_22 = arith.constant 0.000000e+00 : f32
    %42 = vector.shape_cast %18 : vector<1x256xi1> to vector<1x256xi1>
    %43 = vector.broadcast %42 : vector<1x256xi1> to vector<4x256xi1>
    %44 = vector.broadcast %cst_22 : f32 to vector<4x256xf32>
    %45 = arith.select %43, %41, %44 : vector<4x256xi1>, vector<4x256xf32>
    %c0_23 = arith.constant 0 : index
    %c17_24 = arith.constant 17 : index
    %46 = vector.load %arg7[%c0_23, %c17_24] : memref<4x290xf32, #tpu.memory_space<vmem>>, vector<4x256xf32>
    %c0_25 = arith.constant 0 : index
    %c18 = arith.constant 18 : index
    %47 = vector.load %arg7[%c0_25, %c18] : memref<4x290xf32, #tpu.memory_space<vmem>>, vector<4x256xf32>
    %cst_26 = arith.constant 0.000000e+00 : f32
    %48 = vector.shape_cast %20 : vector<1x256xi1> to vector<1x256xi1>
    %49 = vector.broadcast %48 : vector<1x256xi1> to vector<4x256xi1>
    %50 = vector.broadcast %cst_26 : f32 to vector<4x256xf32>
    %51 = arith.select %49, %47, %50 : vector<4x256xi1>, vector<4x256xf32>
    %c0_27 = arith.constant 0 : index
    %c32 = arith.constant 32 : index
    %52 = vector.load %arg7[%c0_27, %c32] : memref<4x290xf32, #tpu.memory_space<vmem>>, vector<4x256xf32>
    %cst_28 = arith.constant 0.000000e+00 : f32
    %53 = vector.shape_cast %18 : vector<1x256xi1> to vector<1x256xi1>
    %54 = vector.broadcast %53 : vector<1x256xi1> to vector<4x256xi1>
    %55 = vector.broadcast %cst_28 : f32 to vector<4x256xf32>
    %56 = arith.select %54, %52, %55 : vector<4x256xi1>, vector<4x256xf32>
    %c0_29 = arith.constant 0 : index
    %c33 = arith.constant 33 : index
    %57 = vector.load %arg7[%c0_29, %c33] : memref<4x290xf32, #tpu.memory_space<vmem>>, vector<4x256xf32>
    %c0_30 = arith.constant 0 : index
    %c34 = arith.constant 34 : index
    %58 = vector.load %arg7[%c0_30, %c34] : memref<4x290xf32, #tpu.memory_space<vmem>>, vector<4x256xf32>
    %cst_31 = arith.constant 0.000000e+00 : f32
    %59 = vector.shape_cast %20 : vector<1x256xi1> to vector<1x256xi1>
    %60 = vector.broadcast %59 : vector<1x256xi1> to vector<4x256xi1>
    %61 = vector.broadcast %cst_31 : f32 to vector<4x256xf32>
    %62 = arith.select %60, %58, %61 : vector<4x256xi1>, vector<4x256xf32>
    %63 = tpu.concatenate %34, %35, %40, %45, %46, %51, %56, %57, %62 in 0 : vector<4x256xf32>, vector<4x256xf32>, vector<4x256xf32>, vector<4x256xf32>, vector<4x256xf32>, vector<4x256xf32>, vector<4x256xf32>, vector<4x256xf32>, vector<4x256xf32> -> vector<36x256xf32>
    %cst_32 = arith.constant dense<0.000000e+00> : vector<4x256xf32>
    %64 = tpu.matmul %26, %63, %cst_32 {dimension_numbers = #tpu.dot_dimension_numbers<[1], [0], [0], [1], [0, 0, 1, 1], [], []>} : vector<4x36xf32>, vector<36x256xf32>, vector<4x256xf32> -> vector<4x256xf32>
    %65 = vector.broadcast %28 : vector<4x1xf32> to vector<4x256xf32>
    %66 = arith.addf %64, %65 : vector<4x256xf32>
    %c0_33 = arith.constant 0 : index
    %c0_34 = arith.constant 0 : index
    %c0_35 = arith.constant 0 : index
    %67 = vector.load %arg4[%c0_33, %c0_34, %c0_35] : memref<2x4x1xf32, #tpu.memory_space<vmem>>, vector<1x4x1xf32>
    %68 = vector.shape_cast %67 : vector<1x4x1xf32> to vector<4x1xf32>
    %c0_36 = arith.constant 0 : index
    %c0_37 = arith.constant 0 : index
    %c0_38 = arith.constant 0 : index
    %69 = vector.load %arg5[%c0_36, %c0_37, %c0_38] : memref<2x4x1xf32, #tpu.memory_space<vmem>>, vector<1x4x1xf32>
    %70 = vector.shape_cast %69 : vector<1x4x1xf32> to vector<4x1xf32>
    %71 = vector.extract_strided_slice %66 {offsets = [0, 0], sizes = [2, 256], strides = [1, 1]} : vector<4x256xf32> to vector<2x256xf32>
    %cst_39 = arith.constant dense<0.000000e+00> : vector<2xf32>
    %72 = vector.multi_reduction <add>, %71, %cst_39 [1] : vector<2x256xf32> to vector<2xf32>
    %73 = vector.shape_cast %72 : vector<2xf32> to vector<2x1xf32>
    %cst_40 = arith.constant dense<0.000000e+00> : vector<1xf32>
    %74 = vector.multi_reduction <add>, %73, %cst_40 [0] : vector<2x1xf32> to vector<1xf32>
    %75 = vector.shape_cast %74 : vector<1xf32> to vector<1x1xf32>
    %cst_41 = arith.constant 5.120000e+02 : f32
    %76 = vector.broadcast %cst_41 : f32 to vector<1x1xf32>
    %77 = arith.divf %75, %76 : vector<1x1xf32>
    %78 = vector.broadcast %77 : vector<1x1xf32> to vector<2x256xf32>
    %79 = arith.subf %71, %78 : vector<2x256xf32>
    %80 = vector.broadcast %77 : vector<1x1xf32> to vector<2x256xf32>
    %81 = arith.subf %71, %80 : vector<2x256xf32>
    %82 = arith.mulf %79, %81 : vector<2x256xf32>
    %cst_42 = arith.constant dense<0.000000e+00> : vector<2xf32>
    %83 = vector.multi_reduction <add>, %82, %cst_42 [1] : vector<2x256xf32> to vector<2xf32>
    %84 = vector.shape_cast %83 : vector<2xf32> to vector<2x1xf32>
    %cst_43 = arith.constant dense<0.000000e+00> : vector<1xf32>
    %85 = vector.multi_reduction <add>, %84, %cst_43 [0] : vector<2x1xf32> to vector<1xf32>
    %86 = vector.shape_cast %85 : vector<1xf32> to vector<1x1xf32>
    %cst_44 = arith.constant 5.120000e+02 : f32
    %87 = vector.broadcast %cst_44 : f32 to vector<1x1xf32>
    %88 = arith.divf %86, %87 : vector<1x1xf32>
    %89 = vector.broadcast %77 : vector<1x1xf32> to vector<2x256xf32>
    %90 = arith.subf %71, %89 : vector<2x256xf32>
    %cst_45 = arith.constant 9.99999974E-6 : f32
    %91 = vector.broadcast %cst_45 : f32 to vector<1x1xf32>
    %92 = arith.addf %88, %91 : vector<1x1xf32>
    %93 = math.rsqrt %92 : vector<1x1xf32>
    %94 = vector.broadcast %93 : vector<1x1xf32> to vector<2x256xf32>
    %95 = arith.mulf %90, %94 : vector<2x256xf32>
    %96 = vector.extract_strided_slice %66 {offsets = [2, 0], sizes = [2, 256], strides = [1, 1]} : vector<4x256xf32> to vector<2x256xf32>
    %cst_46 = arith.constant dense<0.000000e+00> : vector<2xf32>
    %97 = vector.multi_reduction <add>, %96, %cst_46 [1] : vector<2x256xf32> to vector<2xf32>
    %98 = vector.shape_cast %97 : vector<2xf32> to vector<2x1xf32>
    %cst_47 = arith.constant dense<0.000000e+00> : vector<1xf32>
    %99 = vector.multi_reduction <add>, %98, %cst_47 [0] : vector<2x1xf32> to vector<1xf32>
    %100 = vector.shape_cast %99 : vector<1xf32> to vector<1x1xf32>
    %cst_48 = arith.constant 5.120000e+02 : f32
    %101 = vector.broadcast %cst_48 : f32 to vector<1x1xf32>
    %102 = arith.divf %100, %101 : vector<1x1xf32>
    %103 = vector.broadcast %102 : vector<1x1xf32> to vector<2x256xf32>
    %104 = arith.subf %96, %103 : vector<2x256xf32>
    %105 = vector.broadcast %102 : vector<1x1xf32> to vector<2x256xf32>
    %106 = arith.subf %96, %105 : vector<2x256xf32>
    %107 = arith.mulf %104, %106 : vector<2x256xf32>
    %cst_49 = arith.constant dense<0.000000e+00> : vector<2xf32>
    %108 = vector.multi_reduction <add>, %107, %cst_49 [1] : vector<2x256xf32> to vector<2xf32>
    %109 = vector.shape_cast %108 : vector<2xf32> to vector<2x1xf32>
    %cst_50 = arith.constant dense<0.000000e+00> : vector<1xf32>
    %110 = vector.multi_reduction <add>, %109, %cst_50 [0] : vector<2x1xf32> to vector<1xf32>
    %111 = vector.shape_cast %110 : vector<1xf32> to vector<1x1xf32>
    %cst_51 = arith.constant 5.120000e+02 : f32
    %112 = vector.broadcast %cst_51 : f32 to vector<1x1xf32>
    %113 = arith.divf %111, %112 : vector<1x1xf32>
    %114 = vector.broadcast %102 : vector<1x1xf32> to vector<2x256xf32>
    %115 = arith.subf %96, %114 : vector<2x256xf32>
    %cst_52 = arith.constant 9.99999974E-6 : f32
    %116 = vector.broadcast %cst_52 : f32 to vector<1x1xf32>
    %117 = arith.addf %113, %116 : vector<1x1xf32>
    %118 = math.rsqrt %117 : vector<1x1xf32>
    %119 = vector.broadcast %118 : vector<1x1xf32> to vector<2x256xf32>
    %120 = arith.mulf %115, %119 : vector<2x256xf32>
    %121 = tpu.concatenate %95, %120 in 0 : vector<2x256xf32>, vector<2x256xf32> -> vector<4x256xf32>
    %122 = vector.broadcast %68 : vector<4x1xf32> to vector<4x256xf32>
    %123 = arith.mulf %121, %122 : vector<4x256xf32>
    %124 = vector.broadcast %70 : vector<4x1xf32> to vector<4x256xf32>
    %125 = arith.addf %123, %124 : vector<4x256xf32>
    %126 = arith.addf %125, %24 : vector<4x256xf32>
    %cst_53 = arith.constant 5.000000e-01 : f32
    %127 = vector.broadcast %cst_53 : f32 to vector<4x256xf32>
    %128 = arith.mulf %127, %126 : vector<4x256xf32>
    %cst_54 = arith.constant 4.471500e-02 : f32
    %129 = vector.broadcast %cst_54 : f32 to vector<4x256xf32>
    %130 = arith.mulf %129, %126 : vector<4x256xf32>
    %131 = arith.mulf %130, %126 : vector<4x256xf32>
    %132 = arith.mulf %131, %126 : vector<4x256xf32>
    %133 = arith.addf %126, %132 : vector<4x256xf32>
    %cst_55 = arith.constant 0.797884583 : f32
    %134 = vector.broadcast %cst_55 : f32 to vector<4x256xf32>
    %135 = arith.mulf %134, %133 : vector<4x256xf32>
    %136 = math.tanh %135 : vector<4x256xf32>
    %cst_56 = arith.constant 1.000000e+00 : f32
    %137 = vector.broadcast %cst_56 : f32 to vector<4x256xf32>
    %138 = arith.addf %137, %136 : vector<4x256xf32>
    %139 = arith.mulf %128, %138 : vector<4x256xf32>
    %c1_57 = arith.constant 1 : index
    %c0_58 = arith.constant 0 : index
    %c0_59 = arith.constant 0 : index
    %140 = vector.load %arg2[%c1_57, %c0_58, %c0_59] : memref<3x4x36xf32, #tpu.memory_space<vmem>>, vector<1x4x36xf32>
    %141 = vector.shape_cast %140 : vector<1x4x36xf32> to vector<4x36xf32>
    %c1_60 = arith.constant 1 : index
    %c0_61 = arith.constant 0 : index
    %c0_62 = arith.constant 0 : index
    %142 = vector.load %arg3[%c1_60, %c0_61, %c0_62] : memref<3x4x1xf32, #tpu.memory_space<vmem>>, vector<1x4x1xf32>
    %143 = vector.shape_cast %142 : vector<1x4x1xf32> to vector<4x1xf32>
    %c0_63 = arith.constant 0 : index
    %c17_64 = arith.constant 17 : index
    %144 = vector.load %arg7[%c0_63, %c17_64] : memref<4x290xf32, #tpu.memory_space<vmem>>, vector<4x256xf32>
    tpu.vector_store %arg7[%c0_63, %c17_64], %139 {strides = array<i32>} : memref<4x290xf32, #tpu.memory_space<vmem>>, vector<4x256xf32>,
    %c0_65 = arith.constant 0 : index
    %c0_66 = arith.constant 0 : index
    %145 = vector.load %arg7[%c0_65, %c0_66] : memref<4x290xf32, #tpu.memory_space<vmem>>, vector<4x256xf32>
    %cst_67 = arith.constant 0.000000e+00 : f32
    %146 = vector.shape_cast %18 : vector<1x256xi1> to vector<1x256xi1>
    %147 = vector.broadcast %146 : vector<1x256xi1> to vector<4x256xi1>
    %148 = vector.broadcast %cst_67 : f32 to vector<4x256xf32>
    %149 = arith.select %147, %145, %148 : vector<4x256xi1>, vector<4x256xf32>
    %c0_68 = arith.constant 0 : index
    %c1_69 = arith.constant 1 : index
    %150 = vector.load %arg7[%c0_68, %c1_69] : memref<4x290xf32, #tpu.memory_space<vmem>>, vector<4x256xf32>
    %c0_70 = arith.constant 0 : index
    %c2_71 = arith.constant 2 : index
    %151 = vector.load %arg7[%c0_70, %c2_71] : memref<4x290xf32, #tpu.memory_space<vmem>>, vector<4x256xf32>
    %cst_72 = arith.constant 0.000000e+00 : f32
    %152 = vector.shape_cast %20 : vector<1x256xi1> to vector<1x256xi1>
    %153 = vector.broadcast %152 : vector<1x256xi1> to vector<4x256xi1>
    %154 = vector.broadcast %cst_72 : f32 to vector<4x256xf32>
    %155 = arith.select %153, %151, %154 : vector<4x256xi1>, vector<4x256xf32>
    %c0_73 = arith.constant 0 : index
    %c16_74 = arith.constant 16 : index
    %156 = vector.load %arg7[%c0_73, %c16_74] : memref<4x290xf32, #tpu.memory_space<vmem>>, vector<4x256xf32>
    %cst_75 = arith.constant 0.000000e+00 : f32
    %157 = vector.shape_cast %18 : vector<1x256xi1> to vector<1x256xi1>
    %158 = vector.broadcast %157 : vector<1x256xi1> to vector<4x256xi1>
    %159 = vector.broadcast %cst_75 : f32 to vector<4x256xf32>
    %160 = arith.select %158, %156, %159 : vector<4x256xi1>, vector<4x256xf32>
    %c0_76 = arith.constant 0 : index
    %c17_77 = arith.constant 17 : index
    %161 = vector.load %arg7[%c0_76, %c17_77] : memref<4x290xf32, #tpu.memory_space<vmem>>, vector<4x256xf32>
    %c0_78 = arith.constant 0 : index
    %c18_79 = arith.constant 18 : index
    %162 = vector.load %arg7[%c0_78, %c18_79] : memref<4x290xf32, #tpu.memory_space<vmem>>, vector<4x256xf32>
    %cst_80 = arith.constant 0.000000e+00 : f32
    %163 = vector.shape_cast %20 : vector<1x256xi1> to vector<1x256xi1>
    %164 = vector.broadcast %163 : vector<1x256xi1> to vector<4x256xi1>
    %165 = vector.broadcast %cst_80 : f32 to vector<4x256xf32>
    %166 = arith.select %164, %162, %165 : vector<4x256xi1>, vector<4x256xf32>
    %c0_81 = arith.constant 0 : index
    %c32_82 = arith.constant 32 : index
    %167 = vector.load %arg7[%c0_81, %c32_82] : memref<4x290xf32, #tpu.memory_space<vmem>>, vector<4x256xf32>
    %cst_83 = arith.constant 0.000000e+00 : f32
    %168 = vector.shape_cast %18 : vector<1x256xi1> to vector<1x256xi1>
    %169 = vector.broadcast %168 : vector<1x256xi1> to vector<4x256xi1>
    %170 = vector.broadcast %cst_83 : f32 to vector<4x256xf32>
    %171 = arith.select %169, %167, %170 : vector<4x256xi1>, vector<4x256xf32>
    %c0_84 = arith.constant 0 : index
    %c33_85 = arith.constant 33 : index
    %172 = vector.load %arg7[%c0_84, %c33_85] : memref<4x290xf32, #tpu.memory_space<vmem>>, vector<4x256xf32>
    %c0_86 = arith.constant 0 : index
    %c34_87 = arith.constant 34 : index
    %173 = vector.load %arg7[%c0_86, %c34_87] : memref<4x290xf32, #tpu.memory_space<vmem>>, vector<4x256xf32>
    %cst_88 = arith.constant 0.000000e+00 : f32
    %174 = vector.shape_cast %20 : vector<1x256xi1> to vector<1x256xi1>
    %175 = vector.broadcast %174 : vector<1x256xi1> to vector<4x256xi1>
    %176 = vector.broadcast %cst_88 : f32 to vector<4x256xf32>
    %177 = arith.select %175, %173, %176 : vector<4x256xi1>, vector<4x256xf32>
    %178 = tpu.concatenate %149, %150, %155, %160, %161, %166, %171, %172, %177 in 0 : vector<4x256xf32>, vector<4x256xf32>, vector<4x256xf32>, vector<4x256xf32>, vector<4x256xf32>, vector<4x256xf32>, vector<4x256xf32>, vector<4x256xf32>, vector<4x256xf32> -> vector<36x256xf32>
    %cst_89 = arith.constant dense<0.000000e+00> : vector<4x256xf32>
    %179 = tpu.matmul %141, %178, %cst_89 {dimension_numbers = #tpu.dot_dimension_numbers<[1], [0], [0], [1], [0, 0, 1, 1], [], []>} : vector<4x36xf32>, vector<36x256xf32>, vector<4x256xf32> -> vector<4x256xf32>
    %180 = vector.broadcast %143 : vector<4x1xf32> to vector<4x256xf32>
    %181 = arith.addf %179, %180 : vector<4x256xf32>
    %c1_90 = arith.constant 1 : index
    %c0_91 = arith.constant 0 : index
    %c0_92 = arith.constant 0 : index
    %182 = vector.load %arg4[%c1_90, %c0_91, %c0_92] : memref<2x4x1xf32, #tpu.memory_space<vmem>>, vector<1x4x1xf32>
    %183 = vector.shape_cast %182 : vector<1x4x1xf32> to vector<4x1xf32>
    %c1_93 = arith.constant 1 : index
    %c0_94 = arith.constant 0 : index
    %c0_95 = arith.constant 0 : index
    %184 = vector.load %arg5[%c1_93, %c0_94, %c0_95] : memref<2x4x1xf32, #tpu.memory_space<vmem>>, vector<1x4x1xf32>
    %185 = vector.shape_cast %184 : vector<1x4x1xf32> to vector<4x1xf32>
    %186 = vector.extract_strided_slice %181 {offsets = [0, 0], sizes = [2, 256], strides = [1, 1]} : vector<4x256xf32> to vector<2x256xf32>
    %cst_96 = arith.constant dense<0.000000e+00> : vector<2xf32>
    %187 = vector.multi_reduction <add>, %186, %cst_96 [1] : vector<2x256xf32> to vector<2xf32>
    %188 = vector.shape_cast %187 : vector<2xf32> to vector<2x1xf32>
    %cst_97 = arith.constant dense<0.000000e+00> : vector<1xf32>
    %189 = vector.multi_reduction <add>, %188, %cst_97 [0] : vector<2x1xf32> to vector<1xf32>
    %190 = vector.shape_cast %189 : vector<1xf32> to vector<1x1xf32>
    %cst_98 = arith.constant 5.120000e+02 : f32
    %191 = vector.broadcast %cst_98 : f32 to vector<1x1xf32>
    %192 = arith.divf %190, %191 : vector<1x1xf32>
    %193 = vector.broadcast %192 : vector<1x1xf32> to vector<2x256xf32>
    %194 = arith.subf %186, %193 : vector<2x256xf32>
    %195 = vector.broadcast %192 : vector<1x1xf32> to vector<2x256xf32>
    %196 = arith.subf %186, %195 : vector<2x256xf32>
    %197 = arith.mulf %194, %196 : vector<2x256xf32>
    %cst_99 = arith.constant dense<0.000000e+00> : vector<2xf32>
    %198 = vector.multi_reduction <add>, %197, %cst_99 [1] : vector<2x256xf32> to vector<2xf32>
    %199 = vector.shape_cast %198 : vector<2xf32> to vector<2x1xf32>
    %cst_100 = arith.constant dense<0.000000e+00> : vector<1xf32>
    %200 = vector.multi_reduction <add>, %199, %cst_100 [0] : vector<2x1xf32> to vector<1xf32>
    %201 = vector.shape_cast %200 : vector<1xf32> to vector<1x1xf32>
    %cst_101 = arith.constant 5.120000e+02 : f32
    %202 = vector.broadcast %cst_101 : f32 to vector<1x1xf32>
    %203 = arith.divf %201, %202 : vector<1x1xf32>
    %204 = vector.broadcast %192 : vector<1x1xf32> to vector<2x256xf32>
    %205 = arith.subf %186, %204 : vector<2x256xf32>
    %cst_102 = arith.constant 9.99999974E-6 : f32
    %206 = vector.broadcast %cst_102 : f32 to vector<1x1xf32>
    %207 = arith.addf %203, %206 : vector<1x1xf32>
    %208 = math.rsqrt %207 : vector<1x1xf32>
    %209 = vector.broadcast %208 : vector<1x1xf32> to vector<2x256xf32>
    %210 = arith.mulf %205, %209 : vector<2x256xf32>
    %211 = vector.extract_strided_slice %181 {offsets = [2, 0], sizes = [2, 256], strides = [1, 1]} : vector<4x256xf32> to vector<2x256xf32>
    %cst_103 = arith.constant dense<0.000000e+00> : vector<2xf32>
    %212 = vector.multi_reduction <add>, %211, %cst_103 [1] : vector<2x256xf32> to vector<2xf32>
    %213 = vector.shape_cast %212 : vector<2xf32> to vector<2x1xf32>
    %cst_104 = arith.constant dense<0.000000e+00> : vector<1xf32>
    %214 = vector.multi_reduction <add>, %213, %cst_104 [0] : vector<2x1xf32> to vector<1xf32>
    %215 = vector.shape_cast %214 : vector<1xf32> to vector<1x1xf32>
    %cst_105 = arith.constant 5.120000e+02 : f32
    %216 = vector.broadcast %cst_105 : f32 to vector<1x1xf32>
    %217 = arith.divf %215, %216 : vector<1x1xf32>
    %218 = vector.broadcast %217 : vector<1x1xf32> to vector<2x256xf32>
    %219 = arith.subf %211, %218 : vector<2x256xf32>
    %220 = vector.broadcast %217 : vector<1x1xf32> to vector<2x256xf32>
    %221 = arith.subf %211, %220 : vector<2x256xf32>
    %222 = arith.mulf %219, %221 : vector<2x256xf32>
    %cst_106 = arith.constant dense<0.000000e+00> : vector<2xf32>
    %223 = vector.multi_reduction <add>, %222, %cst_106 [1] : vector<2x256xf32> to vector<2xf32>
    %224 = vector.shape_cast %223 : vector<2xf32> to vector<2x1xf32>
    %cst_107 = arith.constant dense<0.000000e+00> : vector<1xf32>
    %225 = vector.multi_reduction <add>, %224, %cst_107 [0] : vector<2x1xf32> to vector<1xf32>
    %226 = vector.shape_cast %225 : vector<1xf32> to vector<1x1xf32>
    %cst_108 = arith.constant 5.120000e+02 : f32
    %227 = vector.broadcast %cst_108 : f32 to vector<1x1xf32>
    %228 = arith.divf %226, %227 : vector<1x1xf32>
    %229 = vector.broadcast %217 : vector<1x1xf32> to vector<2x256xf32>
    %230 = arith.subf %211, %229 : vector<2x256xf32>
    %cst_109 = arith.constant 9.99999974E-6 : f32
    %231 = vector.broadcast %cst_109 : f32 to vector<1x1xf32>
    %232 = arith.addf %228, %231 : vector<1x1xf32>
    %233 = math.rsqrt %232 : vector<1x1xf32>
    %234 = vector.broadcast %233 : vector<1x1xf32> to vector<2x256xf32>
    %235 = arith.mulf %230, %234 : vector<2x256xf32>
    %236 = tpu.concatenate %210, %235 in 0 : vector<2x256xf32>, vector<2x256xf32> -> vector<4x256xf32>
    %237 = vector.broadcast %183 : vector<4x1xf32> to vector<4x256xf32>
    %238 = arith.mulf %236, %237 : vector<4x256xf32>
    %239 = vector.broadcast %185 : vector<4x1xf32> to vector<4x256xf32>
    %240 = arith.addf %238, %239 : vector<4x256xf32>
    %241 = arith.addf %240, %139 : vector<4x256xf32>
    %cst_110 = arith.constant 5.000000e-01 : f32
    %242 = vector.broadcast %cst_110 : f32 to vector<4x256xf32>
    %243 = arith.mulf %242, %241 : vector<4x256xf32>
    %cst_111 = arith.constant 4.471500e-02 : f32
    %244 = vector.broadcast %cst_111 : f32 to vector<4x256xf32>
    %245 = arith.mulf %244, %241 : vector<4x256xf32>
    %246 = arith.mulf %245, %241 : vector<4x256xf32>
    %247 = arith.mulf %246, %241 : vector<4x256xf32>
    %248 = arith.addf %241, %247 : vector<4x256xf32>
    %cst_112 = arith.constant 0.797884583 : f32
    %249 = vector.broadcast %cst_112 : f32 to vector<4x256xf32>
    %250 = arith.mulf %249, %248 : vector<4x256xf32>
    %251 = math.tanh %250 : vector<4x256xf32>
    %cst_113 = arith.constant 1.000000e+00 : f32
    %252 = vector.broadcast %cst_113 : f32 to vector<4x256xf32>
    %253 = arith.addf %252, %251 : vector<4x256xf32>
    %254 = arith.mulf %243, %253 : vector<4x256xf32>
    %c2_114 = arith.constant 2 : index
    %c0_115 = arith.constant 0 : index
    %c0_116 = arith.constant 0 : index
    %255 = vector.load %arg2[%c2_114, %c0_115, %c0_116] : memref<3x4x36xf32, #tpu.memory_space<vmem>>, vector<1x4x36xf32>
    %256 = vector.shape_cast %255 : vector<1x4x36xf32> to vector<4x36xf32>
    %c2_117 = arith.constant 2 : index
    %c0_118 = arith.constant 0 : index
    %c0_119 = arith.constant 0 : index
    %257 = vector.load %arg3[%c2_117, %c0_118, %c0_119] : memref<3x4x1xf32, #tpu.memory_space<vmem>>, vector<1x4x1xf32>
    %258 = vector.shape_cast %257 : vector<1x4x1xf32> to vector<4x1xf32>
    %c0_120 = arith.constant 0 : index
    %c17_121 = arith.constant 17 : index
    %259 = vector.load %arg7[%c0_120, %c17_121] : memref<4x290xf32, #tpu.memory_space<vmem>>, vector<4x256xf32>
    tpu.vector_store %arg7[%c0_120, %c17_121], %254 {strides = array<i32>} : memref<4x290xf32, #tpu.memory_space<vmem>>, vector<4x256xf32>,
    %c0_122 = arith.constant 0 : index
    %c0_123 = arith.constant 0 : index
    %260 = vector.load %arg7[%c0_122, %c0_123] : memref<4x290xf32, #tpu.memory_space<vmem>>, vector<4x256xf32>
    %cst_124 = arith.constant 0.000000e+00 : f32
    %261 = vector.shape_cast %18 : vector<1x256xi1> to vector<1x256xi1>
    %262 = vector.broadcast %261 : vector<1x256xi1> to vector<4x256xi1>
    %263 = vector.broadcast %cst_124 : f32 to vector<4x256xf32>
    %264 = arith.select %262, %260, %263 : vector<4x256xi1>, vector<4x256xf32>
    %c0_125 = arith.constant 0 : index
    %c1_126 = arith.constant 1 : index
    %265 = vector.load %arg7[%c0_125, %c1_126] : memref<4x290xf32, #tpu.memory_space<vmem>>, vector<4x256xf32>
    %c0_127 = arith.constant 0 : index
    %c2_128 = arith.constant 2 : index
    %266 = vector.load %arg7[%c0_127, %c2_128] : memref<4x290xf32, #tpu.memory_space<vmem>>, vector<4x256xf32>
    %cst_129 = arith.constant 0.000000e+00 : f32
    %267 = vector.shape_cast %20 : vector<1x256xi1> to vector<1x256xi1>
    %268 = vector.broadcast %267 : vector<1x256xi1> to vector<4x256xi1>
    %269 = vector.broadcast %cst_129 : f32 to vector<4x256xf32>
    %270 = arith.select %268, %266, %269 : vector<4x256xi1>, vector<4x256xf32>
    %c0_130 = arith.constant 0 : index
    %c16_131 = arith.constant 16 : index
    %271 = vector.load %arg7[%c0_130, %c16_131] : memref<4x290xf32, #tpu.memory_space<vmem>>, vector<4x256xf32>
    %cst_132 = arith.constant 0.000000e+00 : f32
    %272 = vector.shape_cast %18 : vector<1x256xi1> to vector<1x256xi1>
    %273 = vector.broadcast %272 : vector<1x256xi1> to vector<4x256xi1>
    %274 = vector.broadcast %cst_132 : f32 to vector<4x256xf32>
    %275 = arith.select %273, %271, %274 : vector<4x256xi1>, vector<4x256xf32>
    %c0_133 = arith.constant 0 : index
    %c17_134 = arith.constant 17 : index
    %276 = vector.load %arg7[%c0_133, %c17_134] : memref<4x290xf32, #tpu.memory_space<vmem>>, vector<4x256xf32>
    %c0_135 = arith.constant 0 : index
    %c18_136 = arith.constant 18 : index
    %277 = vector.load %arg7[%c0_135, %c18_136] : memref<4x290xf32, #tpu.memory_space<vmem>>, vector<4x256xf32>
    %cst_137 = arith.constant 0.000000e+00 : f32
    %278 = vector.shape_cast %20 : vector<1x256xi1> to vector<1x256xi1>
    %279 = vector.broadcast %278 : vector<1x256xi1> to vector<4x256xi1>
    %280 = vector.broadcast %cst_137 : f32 to vector<4x256xf32>
    %281 = arith.select %279, %277, %280 : vector<4x256xi1>, vector<4x256xf32>
    %c0_138 = arith.constant 0 : index
    %c32_139 = arith.constant 32 : index
    %282 = vector.load %arg7[%c0_138, %c32_139] : memref<4x290xf32, #tpu.memory_space<vmem>>, vector<4x256xf32>
    %cst_140 = arith.constant 0.000000e+00 : f32
    %283 = vector.shape_cast %18 : vector<1x256xi1> to vector<1x256xi1>
    %284 = vector.broadcast %283 : vector<1x256xi1> to vector<4x256xi1>
    %285 = vector.broadcast %cst_140 : f32 to vector<4x256xf32>
    %286 = arith.select %284, %282, %285 : vector<4x256xi1>, vector<4x256xf32>
    %c0_141 = arith.constant 0 : index
    %c33_142 = arith.constant 33 : index
    %287 = vector.load %arg7[%c0_141, %c33_142] : memref<4x290xf32, #tpu.memory_space<vmem>>, vector<4x256xf32>
    %c0_143 = arith.constant 0 : index
    %c34_144 = arith.constant 34 : index
    %288 = vector.load %arg7[%c0_143, %c34_144] : memref<4x290xf32, #tpu.memory_space<vmem>>, vector<4x256xf32>
    %cst_145 = arith.constant 0.000000e+00 : f32
    %289 = vector.shape_cast %20 : vector<1x256xi1> to vector<1x256xi1>
    %290 = vector.broadcast %289 : vector<1x256xi1> to vector<4x256xi1>
    %291 = vector.broadcast %cst_145 : f32 to vector<4x256xf32>
    %292 = arith.select %290, %288, %291 : vector<4x256xi1>, vector<4x256xf32>
    %293 = tpu.concatenate %264, %265, %270, %275, %276, %281, %286, %287, %292 in 0 : vector<4x256xf32>, vector<4x256xf32>, vector<4x256xf32>, vector<4x256xf32>, vector<4x256xf32>, vector<4x256xf32>, vector<4x256xf32>, vector<4x256xf32>, vector<4x256xf32> -> vector<36x256xf32>
    %cst_146 = arith.constant dense<0.000000e+00> : vector<4x256xf32>
    %294 = tpu.matmul %256, %293, %cst_146 {dimension_numbers = #tpu.dot_dimension_numbers<[1], [0], [0], [1], [0, 0, 1, 1], [], []>} : vector<4x36xf32>, vector<36x256xf32>, vector<4x256xf32> -> vector<4x256xf32>
    %295 = vector.broadcast %258 : vector<4x1xf32> to vector<4x256xf32>
    %296 = arith.addf %294, %295 : vector<4x256xf32>
    %c0_147 = arith.constant 0 : index
    %c0_148 = arith.constant 0 : index
    %c0_149 = arith.constant 0 : index
    %297 = vector.load %arg6[%c0_147, %c0_148, %c0_149] : memref<1x4x256xf32, #tpu.memory_space<vmem>>, vector<1x4x256xf32>
    %298 = vector.shape_cast %297 : vector<1x4x256xf32> to vector<4x256xf32>
    %299 = vector.shape_cast %296 : vector<4x256xf32> to vector<1x4x256xf32>
    tpu.vector_store %arg6[%c0_147, %c0_148, %c0_149], %299 {strides = array<i32>} : memref<1x4x256xf32, #tpu.memory_space<vmem>>, vector<1x4x256xf32>,
    return
  }
  func.func @transform_0(%arg0: i32) -> (i32, i32, i32) {
    %c0_i32 = arith.constant 0 : i32
    %c0_i32_0 = arith.constant 0 : i32
    %c0_i32_1 = arith.constant 0 : i32
    return %arg0, %c0_i32, %c0_i32_0 : i32, i32, i32
  }
  func.func @transform_1(%arg0: i32) -> (i32, i32, i32) {
    %c0_i32 = arith.constant 0 : i32
    %c0_i32_0 = arith.constant 0 : i32
    %c0_i32_1 = arith.constant 0 : i32
    %c0_i32_2 = arith.constant 0 : i32
    return %c0_i32, %c0_i32_0, %c0_i32_1 : i32, i32, i32
  }
  func.func @transform_2(%arg0: i32) -> (i32, i32, i32) {
    %c0_i32 = arith.constant 0 : i32
    %c0_i32_0 = arith.constant 0 : i32
    %c0_i32_1 = arith.constant 0 : i32
    %c0_i32_2 = arith.constant 0 : i32
    return %c0_i32, %c0_i32_0, %c0_i32_1 : i32, i32, i32
  }
  func.func @transform_3(%arg0: i32) -> (i32, i32, i32) {
    %c0_i32 = arith.constant 0 : i32
    %c0_i32_0 = arith.constant 0 : i32
    %c0_i32_1 = arith.constant 0 : i32
    %c0_i32_2 = arith.constant 0 : i32
    return %c0_i32, %c0_i32_0, %c0_i32_1 : i32, i32, i32
  }
  func.func @transform_4(%arg0: i32) -> (i32, i32, i32) {
    %c0_i32 = arith.constant 0 : i32
    %c0_i32_0 = arith.constant 0 : i32
    %c0_i32_1 = arith.constant 0 : i32
    %c0_i32_2 = arith.constant 0 : i32
    return %c0_i32, %c0_i32_0, %c0_i32_1 : i32, i32, i32
  }
  func.func @transform_5(%arg0: i32) -> (i32, i32, i32) {
    %c0_i32 = arith.constant 0 : i32
    %c0_i32_0 = arith.constant 0 : i32
    %c0_i32_1 = arith.constant 0 : i32
    return %arg0, %c0_i32, %c0_i32_0 : i32, i32, i32
  }
}

</mosaic_0001>

<bundles_post_ra>
// kernel: tpu_custom_call.1
= control target key start
LH: loop header
LB: loop body
LE: loop exit
PB: predicated region body
PF: predicated region fallthrough
CT: control target
= control target key end

     0   :  { %10 = vsyncpa [#allocation4], 0  ;;  %s2206_s0 = inlined_call_operand.vmem [shape: f32[2,4,256], index: 0, kind: input, shape index: {}]   ;;  %s2207_s1 = inlined_call_operand.vmem [shape: f32[3,4,36], index: 1, kind: input, shape index: {}]   ;;  %s2208_s2 = inlined_call_operand.vmem [shape: f32[3,4,1], index: 2, kind: input, shape index: {}]   ;;  %s2209_s3 = inlined_call_operand.vmem [shape: f32[2,4,1], index: 3, kind: input, shape index: {}]   ;;  %s2210_s4 = inlined_call_operand.vmem [shape: f32[2,4,1], index: 4, kind: input, shape index: {}]   ;;  %s2211_s5 = inlined_call_operand.hbm [shape: f32[2,4,256], index: 5, kind: output, shape index: {}]  }
   0x1   :  { %12 = vsyncpa [#allocation4 + $0x1], 0  ;;  %s1726_s18 = smov 0   ;;  %s1728_s19 = smov 0  }
   0x2   :  { %s1730_s20 = smov 0   ;;  %s1732_s21 = smov 0  }
   0x3 LB: > { %s1747_s22 = sadd.s32 4294967295, %s1682_s21   ;;  %s1411_s23 = sadd.s32 4294967294, %s1682_s21   ;;  %s1682_s21 = sphi %s1732_s21, %s2272_s21   ;;  %s1678_s20 = sphi %s1730_s20, %s2271_s20   ;;  %s1674_s19 = sphi %s1728_s19, %s2270_s19   ;;  %s1670_s18 = sphi %s1726_s18, %s2269_s18  }
   0x4   : > { %s1751_s24 = sadd.s32 1, %s1682_s21   ;;  %s135_s25 = sadd.s32 1, %s1678_s20 }
   0x5   : > { %s132_s26 = ssub.s32 %s1682_s21, %s1751_s24  ;;  %p145_p0 = scmp.ne.s32.totalorder %s1678_s20, %s1674_s19 }
   0x6   : > { %p133_p1 = scmp.eq.s32.totalorder %s132_s26, 0  ;;  %p146_p2 = scmp.eq.s32.totalorder %s1747_s22, 1 }
   0x7   : > { %p151_p3 = scmp.ne.s32.totalorder %s1674_s19, %s1670_s18  ;;  %p152_p4 = scmp.eq.s32.totalorder %s1411_s23, 1 }
   0x8   : > { %s1762_s27 = scalar_select %p133_p1, %s1678_s20, %s135_s25  }
   0x9   : > { %p1764_p5 = por %p146_p2, %p145_p0  ;;  %p1768_p6 = por %p152_p4, %p151_p3 }
   0xa   : > { %p1414_p7 = scmp.ge.s32.totalorder %s1682_s21, 1  ;;  %p190_p8 = scmp.lt.s32.totalorder %s1682_s21, 3 }
   0xc   : > { %p191_p9 = pnand %p1414_p7, %p190_p8 }
   0xd   : > { %p218_p10 = scmp.lt.s32.totalorder (!%p191_p9), %s1747_s22, 1  ;;  %s1685_s10 = smov (!%p191_p9), 17  }
   0xe   : > { %194 = sbr.rel (%p191_p9) target bundleno = 2063 (0x80f), region = 40  ;;  %s1686_s11 = smov (!%p191_p9), 112  }
   0xf   : > { %s1687_s12 = smov (!%p191_p9), 126   ;;  %s1688_s13 = smov (!%p191_p9), 110  }
  0x10   : > { %s1689_s14 = smov (!%p191_p9), 96   ;;  %s1690_s15 = smov (!%p191_p9), 94  }
  0x11   : > { %s1691_s16 = smov (!%p191_p9), 111   ;;  %s1692_s17 = smov (!%p191_p9), 95  }
  0x12   : > { %s1693_s23 = smov (!%p191_p9), 127  }
  0x13   : > { %vm255_vm0 = vcmask 273408   ;;  %v1684_v0 = vmov 0.0   ;;  %s219_s30 = scalar_select %p218_p10, %s1747_s22, 1  ;;  %vm268_vm1 = vcmask 1043592   ;;  %vm269_vm2 = vcmask 1047556  }
  0x14   : > { %254 = vst [vmem:[#allocation2] sm:$0xff] %v1684_v0  ;;  %vm264_vm3 = vcmask 138240   ;;  %vm272_vm4 = vcmask 134144   ;;  %vm1783_vm5 = vmor %vm269_vm2, %vm268_vm1  ;;  %v223_v50 = vlaneseq  ;;  %vm399_vm6 = vcmask 769024  }
  0x15   : > { %256 = vst.msk [vmem:[#allocation2 + $0x8] sm:$0xf] %vm255_vm0, %v1684_v0  ;;  %s1441_s6 = sshll.u32 %s219_s30, 3  ;;  %vm2220_vm7 = vcmask 785408   ;;  %vm471_vm9 = vcmask 1043456   ;;  %vm2219_vm11 = vcmask 777216  }
  0x16   : > { %s222_s9 = scalar_lea.vmem %s2206_s0, %s1441_s6  ;;  %v224_v51 = vand.u32 127, %v223_v50  ;;  %vm2218_vm14 = vcmask 900096   ;;  %vm2214_vm15 = vcmask 916480   ;;  %vm2213_vm0 = vcmask 1031168  }
  0x17   : > { %v1779_v1 = vld [vmem:[%s222_s9] sm:$0xff]  ;;  %vm2212_vm1 = vcmask 908288   ;;  %vm2217_vm2 = vcmask 1039360  }
  0x18   : > { %261 = vrot.lane.b32.xlu0 %v1779_v1, %s1685_s10  ;;  %v225_v55 = vadd.s32 128, %v224_v51  ;;  %v230_v58 = vand.u32 15, %v224_v51 }
  0x1a   : > { %v237_v59 = vand.u32 15, %v225_v55  ;;  %vm1833_vm8 = vcmp.le.s32.totalorder %v230_v58, 14  ;;  %vm1850_vm12 = vcmp.ge.s32.totalorder %v230_v58, 1 }
  0x1c   : > { %vm1837_vm10 = vcmp.le.s32.totalorder %v237_v59, 14  ;;  %vm1862_vm13 = vcmp.ge.s32.totalorder %v237_v59, 1 }
  0x8a   : > { %v262_v2 = vpop.permute.xlu0 %261 }
  0x8b   : > { %v263_v4 = vrot.slane %v262_v2, 4 }
  0x8d   : > { %v265_v5 = vsel %vm264_vm3, %v263_v4, %v262_v2  ;;  %273 = vst.msk [vmem:[#allocation2 + $0x8] sm:$0xf] %vm272_vm4, %v263_v4 }
  0x8e   : > { %271 = vst.msk [vmem:[#allocation2] sm:$0xff] %vm1783_vm5, %v265_v5 }
  0x94   : > { %v288_v6 = vld [vmem:[#allocation2 + $0x8] sm:$0xf] }
  0x95   : > { %v1791_v7 = vld [vmem:[#allocation2] sm:$0xff]  ;;  %297 = vst [vmem:[#allocation1 + $0x10] ss:$2 sm:$0xff] %v288_v6  ;;  %v315_v11 = vld [vmem:[#allocation2 + $0x8] sm:$0xf] }
  0x96   : > { %280 = vst [vmem:[#allocation1] ss:$2 sm:$0xff] %v1791_v7  ;;  %v338_v12 = vld [vmem:[#allocation2 + $0x8] sm:$0xf] }
  0x97   : > { %v361_v16 = vld [vmem:[#allocation2 + $0x8] sm:$0xf] }
  0x98   : > { %v384_v22 = vld [vmem:[#allocation2 + $0x8] sm:$0xf] }
  0x9c   : > { %v1794_v8 = vld.sshfl [vmem:[#allocation1 + $0x10] sm:$0xff pattern:$0x75316420] }
  0x9d   : > { %v1796_v9 = vld.sshfl [vmem:[#allocation1] sm:$0xff pattern:$0x75316420]  ;;  %v1798_v10 = vld.sshfl [vmem:[#allocation1 + $0x8] sm:$0xff pattern:$0x75316420] }
  0x9e   : > { %295 = vst [vmem:[#allocation1] ss:$2 sm:$0xff] %v1791_v7 }
  0x9f   : > { %320 = vst [vmem:[#allocation1 + $0x10] ss:$2 sm:$0xff] %v315_v11 }
  0xa5   : > { %v298_v13 = vld.sshfl [vmem:[#allocation1] sm:$0xff pattern:$0x75316420]  ;;  %v299_v14 = vld.sshfl [vmem:[#allocation1 + $0x8] sm:$0xff pattern:$0x75316420] }
  0xa6   : > { %318 = vst [vmem:[#allocation1] ss:$2 sm:$0xff] %v1791_v7  ;;  %v323_v15 = vld.sshfl [vmem:[#allocation1 + $0x10] sm:$0xff pattern:$0x75316420]  ;;  %v1494_v19 = vpack.i.bf16 %v299_v14, %v298_v13 }
  0xa7   : > { %343 = vst [vmem:[#allocation1 + $0x10] ss:$2 sm:$0xff] %v338_v12  ;;  %328 = vrot.lane.b32.xlu2 %v323_v15, %s1686_s11  ;;  %v259_v15 = vld [vmem:[%s2208_s2] sm:$0xf] }
  0xad   : > { %v321_v17 = vld.sshfl [vmem:[#allocation1] sm:$0xff pattern:$0x75316420]  ;;  %v322_v18 = vld.sshfl [vmem:[#allocation1 + $0x8] sm:$0xff pattern:$0x75316420] }
  0xae   : > { %341 = vst [vmem:[#allocation1] ss:$2 sm:$0xff] %v1791_v7  ;;  %v346_v20 = vld.sshfl [vmem:[#allocation1 + $0x10] sm:$0xff pattern:$0x75316420]  ;;  %v1499_v21 = vpack.i.bf16 %v322_v18, %v321_v17 }
  0xaf   : > { %366 = vst [vmem:[#allocation1 + $0x10] ss:$2 sm:$0xff] %v361_v16  ;;  %1495 = vrot.lane.b32.xlu2 %v1494_v19, %s1687_s12  ;;  %v1694_v16 = vmov 0  }
  0xb0   : > { %1500 = vrot.lane.b32.xlu1 %v1499_v21, %s1686_s11  ;;  %1529 = vset.pattern.permute.xlu0 %v1694_v16 }
  0xb1   : > { %1530 = vset.pattern.permute.xlu1 %v1694_v16  ;;  %1531 = vset.pattern.permute.xlu2 %v1694_v16 }
  0xb5   : > { %v344_v23 = vld.sshfl [vmem:[#allocation1] sm:$0xff pattern:$0x75316420]  ;;  %v345_v24 = vld.sshfl [vmem:[#allocation1 + $0x8] sm:$0xff pattern:$0x75316420] }
  0xb6   : > { %364 = vst [vmem:[#allocation1] ss:$2 sm:$0xff] %v1791_v7  ;;  %v369_v25 = vld.sshfl [vmem:[#allocation1 + $0x10] sm:$0xff pattern:$0x75316420]  ;;  %v1504_v28 = vpack.i.bf16 %v345_v24, %v344_v23 }
  0xb7   : > { %389 = vst [vmem:[#allocation1 + $0x10] ss:$2 sm:$0xff] %v384_v22  ;;  %351 = vrot.lane.b32.xlu2 %v346_v20, %s1688_s13 }
  0xb8   : > { %374 = vrot.lane.b32.xlu1 %v369_v25, %s1689_s14 }
  0xbd   : > { %v367_v26 = vld.sshfl [vmem:[#allocation1] sm:$0xff pattern:$0x75316420]  ;;  %v368_v27 = vld.sshfl [vmem:[#allocation1 + $0x8] sm:$0xff pattern:$0x75316420] }
  0xbe   : > { %387 = vst [vmem:[#allocation1] ss:$2 sm:$0xff] %v1791_v7  ;;  %v392_v29 = vld.sshfl [vmem:[#allocation1 + $0x10] sm:$0xff pattern:$0x75316420]  ;;  %v1509_v30 = vpack.i.bf16 %v368_v27, %v367_v26 }
  0xbf   : > { %409 = vst [vmem:[#allocation1 + $0x11] ss:$2 sm:$0xff] %v288_v6  ;;  %1505 = vrot.lane.b32.xlu2 %v1504_v28, %s1688_s13 }
  0xc0   : > { %397 = vrot.lane.b32.xlu1 %v392_v29, %s1690_s15  ;;  %1510 = vrot.lane.b32.xlu0 %v1509_v30, %s1689_s14 }
  0xc5   : > { %v390_v31 = vld.sshfl [vmem:[#allocation1] sm:$0xff pattern:$0x75316420]  ;;  %v391_v32 = vld.sshfl [vmem:[#allocation1 + $0x8] sm:$0xff pattern:$0x75316420] }
  0xc6   : > { %407 = vst [vmem:[#allocation1 + $0x1] ss:$2 sm:$0xff] %v1791_v7  ;;  %v412_v33 = vld.sshfl [vmem:[#allocation1 + $0x10] sm:$0xff pattern:$0x75316420] }
  0xc7   : > { %432 = vst [vmem:[#allocation1 + $0x10] ss:$2 sm:$0xff] %v338_v12 }
  0xc8   : > { %395 = vrot.lane.b32.xlu1 %v391_v32, %s1690_s15  ;;  %393 = vrot.lane.b32.xlu0 %v390_v31, %s1690_s15 }
  0xcd   : > { %v410_v34 = vld.sshfl [vmem:[#allocation1] sm:$0xff pattern:$0x75316420]  ;;  %v411_v35 = vld.sshfl [vmem:[#allocation1 + $0x8] sm:$0xff pattern:$0x75316420] }
  0xce   : > { %430 = vst [vmem:[#allocation1] ss:$2 sm:$0xff] %v1791_v7  ;;  %v435_v36 = vld.sshfl [vmem:[#allocation1 + $0x10] sm:$0xff pattern:$0x75316420]  ;;  %v1519_v40 = vpack.i.bf16 %v411_v35, %v410_v34 }
  0xcf   : > { %456 = vst [vmem:[#allocation1 + $0x11] ss:$2 sm:$0xff] %v384_v22 }
  0xd0   : > { %440 = vrot.lane.b32.xlu1 %v435_v36, %s1691_s16 }
  0xd5   : > { %v433_v37 = vld.sshfl [vmem:[#allocation1] sm:$0xff pattern:$0x75316420]  ;;  %v434_v38 = vld.sshfl [vmem:[#allocation1 + $0x8] sm:$0xff pattern:$0x75316420] }
  0xd6   : > { %454 = vst [vmem:[#allocation1 + $0x1] ss:$2 sm:$0xff] %v1791_v7  ;;  %v459_v39 = vld.sshfl [vmem:[#allocation1 + $0x10] sm:$0xff pattern:$0x75316420]  ;;  %v1514_v41 = vpack.i.bf16 %v434_v38, %v433_v37 }
  0xd7   : > { %464 = vrot.lane.b32.xlu0 %v459_v39, %s1692_s17 }
  0xd8   : > { %1520 = vrot.lane.b32.xlu1 %v1519_v40, %s1693_s23 }
  0xdd   : > { %v457_v42 = vld.sshfl [vmem:[#allocation1] sm:$0xff pattern:$0x75316420]  ;;  %v458_v43 = vld.sshfl [vmem:[#allocation1 + $0x8] sm:$0xff pattern:$0x75316420] }
  0xde   : > { %v1524_v44 = vpack.i.bf16 %v458_v43, %v457_v42  ;;  %654 = vst [vmem:[#allocation1] ss:$2 sm:$0xff] %v1779_v1 }
  0xdf   : > { %1515 = vrot.lane.b32.xlu0 %v1514_v41, %s1691_s16 }
  0xe0   : > { %1525 = vrot.lane.b32.xlu2 %v1524_v44, %s1692_s17 }
  0xe7   : > { %305 = vrot.lane.b32.xlu0 %v1794_v8, %s1687_s12 }
  0xe8   : > { %417 = vrot.lane.b32.xlu2 %v412_v33, %s1693_s23 }
  0xef   : > { %482 = vperm.xlu0 %1529, %v259_v15  }
 0x101   : > { %v1827_v45 = vpop.permute.xlu2 %328 }
 0x109   : > { %v1829_v46 = vpop.permute.xlu2 %1495 }
 0x10a   : > { %v1498_v28 = vunpack.i.h.bf16 %v1829_v46  ;;  %v1497_v29 = vunpack.i.l.bf16 %v1829_v46 }
 0x10c   : > { %v308_v38 = vsel %vm2213_vm0, %v1497_v29, %v1498_v28 }
 0x111   : > { %v352_v48 = vpop.permute.xlu2 %351 }
 0x119   : > { %v1506_v54 = vpop.permute.xlu2 %1505 }
 0x11a   : > { %v1508_v20 = vunpack.i.h.bf16 %v1506_v54  ;;  %v1507_v21 = vunpack.i.l.bf16 %v1506_v54 }
 0x11c   : > { %v354_v30 = vsel %vm2218_vm14, %v1507_v21, %v1508_v20  ;;  %v355_v31 = vsel %vm2218_vm14, %v1508_v20, %v352_v48  ;;  %v535_v21 = vld [vmem:[%s2209_s3] sm:$0xf] }
 0x11d   : > { %v358_v34 = vsel %vm1833_vm8, %v354_v30, 0.0  ;;  %v359_v35 = vsel %vm1837_vm10, %v355_v31, 0.0 }
 0x11e   : > { %v449_v43 = vrot.slane %v358_v34, 4  ;;  %v450_v44 = vrot.slane %v359_v35, 4 }
 0x122   : > { %v1831_v47 = vpop.permute.xlu1 %1500 }
 0x123   : > { %v1503_v22 = vunpack.i.h.bf16 %v1831_v47  ;;  %v1502_v23 = vunpack.i.l.bf16 %v1831_v47 }
 0x125   : > { %v331_v32 = vsel %vm2214_vm15, %v1502_v23, %v1503_v22 }
 0x126   : > { %v335_v36 = vsel %vm1850_vm12, %v331_v32, 0.0 }
 0x127   : > { %v426_v46 = vrot.slane %v335_v36, 4 }
 0x12a   : > { %v375_v49 = vpop.permute.xlu1 %374 }
 0x132   : > { %v398_v52 = vpop.permute.xlu1 %397  ;;  %v1511_v53 = vpop.permute.xlu0 %1510 }
 0x133   : > { %v1513_v56 = vunpack.i.h.bf16 %v1511_v53  ;;  %v1512_v57 = vunpack.i.l.bf16 %v1511_v53 }
 0x135   : > { %v377_v4 = vsel %vm2220_vm7, %v1512_v57, %v1513_v56  ;;  %v378_v18 = vsel %vm2220_vm7, %v1513_v56, %v375_v49  ;;  %v332_v49 = vsel %vm2214_vm15, %v1503_v22, %v1827_v45  ;;  %v285_v45 = vsel %vm1850_vm12, %v1796_v9, 0.0  ;;  %v258_v56 = vld [vmem:[%s2207_s1] sm:$0xf] }
 0x136   : > { %v381_v12 = vsel %vm1850_vm12, %v377_v4, 0.0  ;;  %v382_v26 = vsel %vm1862_vm13, %v378_v18, 0.0  ;;  %v336_v55 = vsel %vm1862_vm13, %v332_v49, 0.0  ;;  %vm537_vm15 = vcmask 1041408  }
 0x137   : > { %v1695_v18 = vmov 512.0  }
 0x138   : > { %1602 = vrcp.f32 %v1695_v18 }
 0x13a   : > { %v396_v60 = vpop.permute.xlu1 %395  ;;  %v394_v61 = vpop.permute.xlu0 %393 }
 0x13b   : > { %v1526_v0 = vpop.permute.xlu2 %1525  ;;  %v400_v1 = vsel %vm399_vm6, %v394_v61, %v396_v60  ;;  %v401_v2 = vsel %vm399_vm6, %v396_v60, %v398_v52  ;;  %v312_v52 = vsel %vm1833_vm8, %v308_v38, 0.0  ;;  %v427_v61 = vrot.slane %v336_v55, 4 }
 0x13c   : > { %v1528_v5 = vunpack.i.h.bf16 %v1526_v0  ;;  %v1527_v6 = vunpack.i.l.bf16 %v1526_v0  ;;  %v404_v7 = vsel %vm1833_vm8, %v400_v1, 0.0  ;;  %v405_v8 = vsel %vm1837_vm10, %v401_v2, 0.0 }
 0x13d   : > { %1418 = vmatpush.msk.msra.mxu0 %vm471_vm9, %v404_v7  ;;  %1420 = vmatpush.msk.msra.mxu1 %vm471_vm9, %v405_v8  ;;  %v474_v54 = vsel %vm471_vm9, %v312_v52, %v426_v46  ;;  %v286_v2 = vsel %vm1862_vm13, %v1798_v10, 0.0 }
 0x13e   : > { %v467_v13 = vsel %vm2219_vm11, %v1527_v6, %v1528_v5  ;;  %v1603_v20 = vpop.eup %1602 }
 0x13f   : > { %v478_v14 = vsel %vm471_vm9, %v381_v12, %v467_v13  ;;  %v551_v22 = vmul.f32 512.0, %v1603_v20 }
 0x140   : > { %507 = vmatpush.msra.mxu0 %v478_v14 }
 0x141   : > { %v552_v23 = vsub.f32 1.0, %v551_v22 }
 0x142   : > { %v441_v17 = vpop.permute.xlu1 %440 }
 0x143   : > { %v418_v59 = vpop.permute.xlu2 %417  ;;  %v553_v30 = vmul.f32 %v1603_v20, %v552_v23 }
 0x145   : > { %v554_v35 = vadd.f32 %v1603_v20, %v553_v30 }
 0x149   : > { %v465_v24 = vpop.permute.xlu0 %464 }
 0x14a   : > { %v468_v25 = vsel %vm2219_vm11, %v1528_v5, %v465_v24  ;;  %v1521_v33 = vpop.permute.xlu1 %1520 }
 0x14b   : > { %v479_v27 = vsel %vm471_vm9, %v382_v26, %v468_v25  ;;  %v1523_v39 = vunpack.i.h.bf16 %v1521_v33  ;;  %v1522_v40 = vunpack.i.l.bf16 %v1521_v33 }
 0x14c   : > { %527 = vmatpush.msra.mxu1 %v479_v27 }
 0x14d   : > { %v420_v53 = vsel %vm2217_vm2, %v1522_v40, %v1523_v39  ;;  %v421_v1 = vsel %vm2217_vm2, %v1523_v39, %v418_v59 }
 0x14e   : > { %v472_v58 = vsel %vm471_vm9, %v285_v45, %v420_v53  ;;  %v473_v4 = vsel %vm471_vm9, %v286_v2, %v421_v1 }
 0x151   : > { %v1516_v37 = vpop.permute.xlu0 %1515 }
 0x152   : > { %v1518_v41 = vunpack.i.h.bf16 %v1516_v37  ;;  %v1517_v42 = vunpack.i.l.bf16 %v1516_v37 }
 0x154   : > { %v443_v47 = vsel %vm2212_vm1, %v1517_v42, %v1518_v41  ;;  %v444_v48 = vsel %vm2212_vm1, %v1518_v41, %v441_v17  ;;  %vm2215_vm1 = vcmask 293888  }
 0x155   : > { %v476_v50 = vsel %vm471_vm9, %v443_v47, %v449_v43  ;;  %v477_v51 = vsel %vm471_vm9, %v444_v48, %v450_v44 }
 0x156   : > { %508 = vmatpush.msra.mxu0 %v476_v50  ;;  %528 = vmatpush.msra.mxu1 %v477_v51 }
 0x158   : > { %509 = vmatpush.msra.mxu0 %v474_v54 }
 0x159   : > { %v306_v57 = vpop.permute.xlu0 %305 }
 0x15a   : > { %v309_v60 = vsel %vm2213_vm0, %v1498_v28, %v306_v57  ;;  %510 = vmatpush.msra.mxu0 %v472_v58  ;;  %vm2216_vm0 = vcmask 1043458  }
 0x15b   : > { %v313_v0 = vsel %vm1837_vm10, %v309_v60, 0.0  ;;  %1419 = vmatmul.msk.f32.vlgmr.msra.gmra.mxu0 %vm2215_vm1, %v258_v56  ;;  %v536_v60 = vld [vmem:[%s2210_s4] sm:$0xf] }
 0x15c   : > { %v475_v9 = vsel %vm471_vm9, %v313_v0, %v427_v61 }
 0x15d   : > { %529 = vmatpush.msra.mxu1 %v475_v9 }
 0x15f   : > { %530 = vmatpush.msra.mxu1 %v473_v4 }
 0x160   : > { %1421 = vmatmul.msk.f32.vlgmr.msra.gmra.mxu1 %vm2215_vm1, %v258_v56  ;;  %vm555_vm1 = vweird.f32 %v1603_v20 }
 0x161   : > { %v483_v5 = vpop.permute.xlu0 %482  ;;  %v1923_v40 = vsel %vm555_vm1, %v1603_v20, %v554_v35 }
 0x1d8   : > { %v512_v6 = vpop.f32.mrf.mxu0 }
 0x1d9   : > { %v513_v7 = vadd.f32 %v512_v6, %v483_v5 }
 0x1db   : > { %v589_v13 = vsel %vm2216_vm0, %v513_v7, 0.0  ;;  %v538_v14 = vsel %vm537_vm15, %v513_v7, 0.0 }
 0x1dd   : > { %v532_v8 = vpop.f32.mrf.mxu1 }
 0x1de   : > { %v533_v12 = vadd.f32 %v532_v8, %v483_v5 }
 0x1e0   : > { %v590_v15 = vsel %vm2216_vm0, %v533_v12, 0.0  ;;  %v539_v10 = vsel %vm537_vm15, %v533_v12, 0.0 }
 0x1e1   : > { %v591_v16 = vadd.f32 %v590_v15, %v589_v13  ;;  %v540_v17 = vadd.f32 %v539_v10, %v538_v14 }
 0x1e3   : > { %592 = vadd.xlane.f32.xlu1 %v591_v16  ;;  %541 = vadd.xlane.f32.xlu2 %v540_v17 }
 0x1fc   : > { %642 = vperm.xlu1 %1530, %v535_v21  }
 0x256   : > { %v593_v24 = vpop.xlane.xlu1 %592  ;;  %v542_v25 = vpop.xlane.xlu2 %541 }
 0x257   : > { %v595_v26 = vrot.slane %v593_v24, 2  ;;  %v543_v27 = vsel %vm537_vm15, %v542_v25, 0.0 }
 0x258   : > { %v544_v28 = vrot.slane %v543_v27, 4 }
 0x259   : > { %v597_v29 = vsel %vm537_vm15, %v595_v26, 0.0 }
 0x25a   : > { %v598_v31 = vrot.slane %v597_v29, 4  ;;  %v545_v32 = vadd.f32 %v544_v28, %v543_v27 }
 0x25c   : > { %v599_v33 = vadd.f32 %v598_v31, %v597_v29  ;;  %v546_v34 = vrot.slane %v545_v32, 2 }
 0x25e   : > { %v600_v36 = vrot.slane %v599_v33, 2  ;;  %v547_v37 = vadd.f32 %v546_v34, %v545_v32 }
 0x260   : > { %v601_v38 = vadd.f32 %v600_v36, %v599_v33  ;;  %v548_v39 = vrot.slane %v547_v37, 1 }
 0x262   : > { %v602_v41 = vrot.slane %v601_v38, 1  ;;  %v549_v42 = vadd.f32 %v548_v39, %v547_v37 }
 0x264   : > { %v603_v43 = vadd.f32 %v602_v41, %v601_v38  ;;  %v557_v44 = vmul.f32 %v1923_v40, %v549_v42 }
 0x266   : > { %v1926_v46 = vsub.f32 %v513_v7, %v557_v44  ;;  %v1928_v47 = vsub.f32 %v533_v12, %v557_v44  ;;  %v604_v48 = vmul.f32 %v603_v43, %v1923_v40 }
 0x268   : > { %v560_v49 = vmul.f32 %v1926_v46, %v1926_v46  ;;  %v561_v50 = vmul.f32 %v1928_v47, %v1928_v47  ;;  %v605_v51 = vsub.f32 %v513_v7, %v604_v48  ;;  %v606_v52 = vsub.f32 %v533_v12, %v604_v48 }
 0x26a   : > { %v562_v53 = vsel %vm537_vm15, %v560_v49, 0.0  ;;  %v563_v54 = vsel %vm537_vm15, %v561_v50, 0.0  ;;  %v607_v55 = vmul.f32 %v605_v51, %v605_v51  ;;  %v608_v45 = vmul.f32 %v606_v52, %v606_v52 }
 0x26b   : > { %v564_v56 = vadd.f32 %v563_v54, %v562_v53 }
 0x26c   : > { %v609_v57 = vsel %vm2216_vm0, %v607_v55, 0.0  ;;  %v610_v58 = vsel %vm2216_vm0, %v608_v45, 0.0  ;;  %v655_v55 = vld.sshfl [vmem:[#allocation1] sm:$0xff pattern:$0x75316420] }
 0x26d   : > { %565 = vadd.xlane.f32.xlu2 %v564_v56  ;;  %v611_v59 = vadd.f32 %v610_v58, %v609_v57  ;;  %v656_v45 = vld.sshfl [vmem:[#allocation1 + $0x8] sm:$0xff pattern:$0x75316420] }
 0x26e   : > { %v643_v39 = vpop.permute.xlu1 %642 }
 0x26f   : > { %612 = vadd.xlane.f32.xlu0 %v611_v59 }
 0x285   : > { %649 = vperm.xlu2 %1531, %v536_v60  }
 0x2e0   : > { %v566_v61 = vpop.xlane.xlu2 %565 }
 0x2e1   : > { %v567_v0 = vsel %vm537_vm15, %v566_v61, 0.0 }
 0x2e2   : > { %v568_v1 = vrot.slane %v567_v0, 4  ;;  %v613_v9 = vpop.xlane.xlu0 %612 }
 0x2e3   : > { %v615_v2 = vrot.slane %v613_v9, 2 }
 0x2e4   : > { %v569_v4 = vadd.f32 %v568_v1, %v567_v0 }
 0x2e5   : > { %v617_v5 = vsel %vm537_vm15, %v615_v2, 0.0 }
 0x2e6   : > { %v570_v6 = vrot.slane %v569_v4, 2  ;;  %v618_v7 = vrot.slane %v617_v5, 4 }
 0x2e8   : > { %v571_v8 = vadd.f32 %v570_v6, %v569_v4  ;;  %v619_v12 = vadd.f32 %v618_v7, %v617_v5  ;;  %v650_v48 = vpop.permute.xlu2 %649 }
 0x2ea   : > { %v572_v13 = vrot.slane %v571_v8, 1  ;;  %v620_v14 = vrot.slane %v619_v12, 2 }
 0x2ec   : > { %v573_v15 = vadd.f32 %v572_v13, %v571_v8  ;;  %v621_v10 = vadd.f32 %v620_v14, %v619_v12 }
 0x2ee   : > { %v574_v16 = vmul.f32 %v573_v15, %v1923_v40  ;;  %v622_v17 = vrot.slane %v621_v10, 1 }
 0x2f0   : > { %v575_v18 = vadd.f32 1e-05, %v574_v16  ;;  %v623_v20 = vadd.f32 %v622_v17, %v621_v10 }
 0x2f2   : > { %1604 = vrsqrt.f32 %v575_v18  ;;  %v624_v21 = vmul.f32 %v623_v20, %v1923_v40  ;;  %vm582_vm2 = vweird.f32 %v575_v18 }
 0x2f4   : > { %v625_v22 = vadd.f32 1e-05, %v624_v21 }
 0x2f6   : > { %1606 = vrsqrt.f32 %v625_v22  ;;  %vm632_vm11 = vweird.f32 %v625_v22 }
 0x2f8   : > { %v1605_v23 = vpop.eup %1604 }
 0x2f9   : > { %v577_v24 = vmul.f32 %v1605_v23, %v575_v18  ;;  %vm583_vm1 = vweird.f32 %v1605_v23 }
 0x2fa   : > { %vm584_vm14 = vmor %vm582_vm2, %vm583_vm1  ;;  %vm2237_vm2 = vcmask 900096  }
 0x2fb   : > { %v578_v25 = vmul.f32 %v1605_v23, %v577_v24  ;;  %vm2238_vm1 = vmmov %vm2237_vm2 }
 0x2fc   : > { %v1607_v26 = vpop.eup %1606 }
 0x2fd   : > { %v579_v27 = vmul.f32 0.5, %v578_v25  ;;  %v627_v28 = vmul.f32 %v1607_v26, %v625_v22  ;;  %vm633_vm0 = vweird.f32 %v1607_v26 }
 0x2fe   : > { %vm634_vm7 = vmor %vm632_vm11, %vm633_vm0  ;;  %vm2234_vm11 = vcmask 777216  }
 0x2ff   : > { %v628_v29 = vmul.f32 %v1607_v26, %v627_v28  ;;  %v580_v30 = vsub.f32 1.5, %v579_v27  ;;  %vm2236_vm0 = vmmov %vm2234_vm11 }
 0x301   : > { %v629_v31 = vmul.f32 0.5, %v628_v29  ;;  %v581_v32 = vmul.f32 %v1605_v23, %v580_v30 }
 0x303   : > { %v630_v33 = vsub.f32 1.5, %v629_v31  ;;  %v585_v35 = vsel %vm584_vm14, %v1605_v23, %v581_v32 }
 0x304   : > { %v586_v41 = vmul.f32 %v585_v35, %v1926_v46  ;;  %v587_v42 = vmul.f32 %v585_v35, %v1928_v47 }
 0x305   : > { %v631_v34 = vmul.f32 %v1607_v26, %v630_v33 }
 0x307   : > { %v635_v36 = vsel %vm634_vm7, %v1607_v26, %v631_v34  ;;  %vm2233_vm7 = vcmask 785408  }
 0x308   : > { %v636_v37 = vmul.f32 %v635_v36, %v605_v51  ;;  %v637_v38 = vmul.f32 %v635_v36, %v606_v52  ;;  %vm2235_vm14 = vmmov %vm2233_vm7 }
 0x30a   : > { %v638_v43 = vsel %vm537_vm15, %v586_v41, %v636_v37  ;;  %v639_v44 = vsel %vm537_vm15, %v587_v42, %v637_v38 }
 0x30b   : > { %v645_v49 = vmul.f32 %v643_v39, %v638_v43  ;;  %v646_v50 = vmul.f32 %v643_v39, %v639_v44 }
 0x30d   : > { %v652_v53 = vadd.f32 %v650_v48, %v645_v49  ;;  %v653_v54 = vadd.f32 %v650_v48, %v646_v50 }
 0x30f   : > { %v659_v56 = vadd.f32 %v655_v55, %v652_v53  ;;  %v660_v57 = vadd.f32 %v656_v45, %v653_v54 }
 0x311   : > { %v663_v51 = vmul.f32 0.044715, %v659_v56  ;;  %v664_v52 = vmul.f32 0.044715, %v660_v57  ;;  %v662_v4 = vmul.f32 0.5, %v660_v57  ;;  %v661_v7 = vmul.f32 0.5, %v659_v56 }
 0x313   : > { %v666_v58 = vmul.f32 %v664_v52, %v660_v57  ;;  %v665_v59 = vmul.f32 %v663_v51, %v659_v56 }
 0x315   : > { %v667_v46 = vmul.f32 %v665_v59, %v659_v56  ;;  %v668_v60 = vmul.f32 %v666_v58, %v660_v57 }
 0x317   : > { %v669_v47 = vadd.f32 %v667_v46, %v659_v56  ;;  %v670_v61 = vadd.f32 %v668_v60, %v660_v57  ;;  %v1423_v46 = vld [vmem:[%s2208_s2 + $0x4] sm:$0xf] }
 0x319   : > { %v671_v0 = vmul.f32 0.7978846, %v669_v47  ;;  %v672_v1 = vmul.f32 0.7978846, %v670_v61 }
 0x31b   : > { %1608 = vtanh.f32 %v671_v0 }
 0x31c   : > { %1610 = vtanh.f32 %v672_v1 }
 0x321   : > { %v1609_v9 = vpop.eup %1608 }
 0x322   : > { %v1611_v2 = vpop.eup %1610  ;;  %v675_v5 = vadd.f32 1.0, %v1609_v9 }
 0x323   : > { %v676_v6 = vadd.f32 1.0, %v1611_v2 }
 0x324   : > { %v1952_v12 = vmul.f32 %v675_v5, %v661_v7 }
 0x325   : > { %v1950_v8 = vmul.f32 %v676_v6, %v662_v4 }
 0x327   : > { %v685_v13 = vrot.slane %v1950_v8, 4 }
 0x329   : > { %v686_v14 = vsel %vm471_vm9, %v1952_v12, %v685_v13 }
 0x32a   : > { %687 = vrot.lane.b32.xlu0 %v686_v14, %s1685_s10 }
 0x39c   : > { %v688_v15 = vpop.permute.xlu0 %687 }
 0x39d   : > { %v689_v10 = vrot.slane %v688_v15, 4 }
 0x39f   : > { %v690_v16 = vsel %vm264_vm3, %v689_v10, %v688_v15  ;;  %694 = vst.msk [vmem:[#allocation2 + $0x8] sm:$0xf] %vm272_vm4, %v689_v10 }
 0x3a0   : > { %693 = vst.msk [vmem:[#allocation2] sm:$0xff] %vm1783_vm5, %v690_v16 }
 0x3a6   : > { %v705_v17 = vld [vmem:[#allocation2 + $0x8] sm:$0xf] }
 0x3a7   : > { %v695_v18 = vld [vmem:[#allocation2] sm:$0xff]  ;;  %710 = vst [vmem:[#allocation1 + $0x10] ss:$2 sm:$0xff] %v705_v17  ;;  %v727_v23 = vld [vmem:[#allocation2 + $0x8] sm:$0xf] }
 0x3a8   : > { %697 = vst [vmem:[#allocation1] ss:$2 sm:$0xff] %v695_v18  ;;  %v749_v24 = vld [vmem:[#allocation2 + $0x8] sm:$0xf] }
 0x3a9   : > { %v771_v28 = vld [vmem:[#allocation2 + $0x8] sm:$0xf] }
 0x3aa   : > { %v793_v34 = vld [vmem:[#allocation2 + $0x8] sm:$0xf] }
 0x3ae   : > { %v1962_v20 = vld.sshfl [vmem:[#allocation1 + $0x10] sm:$0xff pattern:$0x75316420] }
 0x3af   : > { %v1964_v21 = vld.sshfl [vmem:[#allocation1] sm:$0xff pattern:$0x75316420]  ;;  %v1966_v22 = vld.sshfl [vmem:[#allocation1 + $0x8] sm:$0xff pattern:$0x75316420] }
 0x3b0   : > { %708 = vst [vmem:[#allocation1] ss:$2 sm:$0xff] %v695_v18 }
 0x3b1   : > { %732 = vst [vmem:[#allocation1 + $0x10] ss:$2 sm:$0xff] %v727_v23 }
 0x3b7   : > { %v711_v25 = vld.sshfl [vmem:[#allocation1] sm:$0xff pattern:$0x75316420]  ;;  %v712_v26 = vld.sshfl [vmem:[#allocation1 + $0x8] sm:$0xff pattern:$0x75316420] }
 0x3b8   : > { %v735_v27 = vld.sshfl [vmem:[#allocation1 + $0x10] sm:$0xff pattern:$0x75316420]  ;;  %730 = vst [vmem:[#allocation1] ss:$2 sm:$0xff] %v695_v18  ;;  %v1532_v29 = vpack.i.bf16 %v712_v26, %v711_v25 }
 0x3b9   : > { %740 = vrot.lane.b32.xlu2 %v735_v27, %s1686_s11  ;;  %754 = vst [vmem:[#allocation1 + $0x10] ss:$2 sm:$0xff] %v749_v24 }
 0x3bf   : > { %v733_v30 = vld.sshfl [vmem:[#allocation1] sm:$0xff pattern:$0x75316420]  ;;  %v734_v31 = vld.sshfl [vmem:[#allocation1 + $0x8] sm:$0xff pattern:$0x75316420] }
 0x3c0   : > { %v1537_v32 = vpack.i.bf16 %v734_v31, %v733_v30  ;;  %752 = vst [vmem:[#allocation1] ss:$2 sm:$0xff] %v695_v18  ;;  %v757_v33 = vld.sshfl [vmem:[#allocation1 + $0x10] sm:$0xff pattern:$0x75316420] }
 0x3c1   : > { %1533 = vrot.lane.b32.xlu2 %v1532_v29, %s1687_s12  ;;  %776 = vst [vmem:[#allocation1 + $0x10] ss:$2 sm:$0xff] %v771_v28 }
 0x3c2   : > { %1538 = vrot.lane.b32.xlu0 %v1537_v32, %s1686_s11 }
 0x3c7   : > { %v755_v35 = vld.sshfl [vmem:[#allocation1] sm:$0xff pattern:$0x75316420]  ;;  %v756_v36 = vld.sshfl [vmem:[#allocation1 + $0x8] sm:$0xff pattern:$0x75316420] }
 0x3c8   : > { %v779_v37 = vld.sshfl [vmem:[#allocation1 + $0x10] sm:$0xff pattern:$0x75316420]  ;;  %774 = vst [vmem:[#allocation1] ss:$2 sm:$0xff] %v695_v18  ;;  %v1542_v42 = vpack.i.bf16 %v756_v36, %v755_v35 }
 0x3c9   : > { %762 = vrot.lane.b32.xlu2 %v757_v33, %s1688_s13  ;;  %798 = vst [vmem:[#allocation1 + $0x10] ss:$2 sm:$0xff] %v793_v34 }
 0x3ca   : > { %784 = vrot.lane.b32.xlu0 %v779_v37, %s1689_s14 }
 0x3cf   : > { %v777_v38 = vld.sshfl [vmem:[#allocation1] sm:$0xff pattern:$0x75316420]  ;;  %v778_v39 = vld.sshfl [vmem:[#allocation1 + $0x8] sm:$0xff pattern:$0x75316420] }
 0x3d0   : > { %v801_v41 = vld.sshfl [vmem:[#allocation1 + $0x10] sm:$0xff pattern:$0x75316420]  ;;  %796 = vst [vmem:[#allocation1] ss:$2 sm:$0xff] %v695_v18  ;;  %v1547_v43 = vpack.i.bf16 %v778_v39, %v777_v38 }
 0x3d1   : > { %806 = vrot.lane.b32.xlu1 %v801_v41, %s1690_s15  ;;  %817 = vst [vmem:[#allocation1 + $0x11] ss:$2 sm:$0xff] %v705_v17 }
 0x3d2   : > { %1543 = vrot.lane.b32.xlu0 %v1542_v42, %s1688_s13 }
 0x3d7   : > { %v800_v44 = vld.sshfl [vmem:[#allocation1 + $0x8] sm:$0xff pattern:$0x75316420]  ;;  %v799_v48 = vld.sshfl [vmem:[#allocation1] sm:$0xff pattern:$0x75316420] }
 0x3d8   : > { %804 = vrot.lane.b32.xlu2 %v800_v44, %s1690_s15  ;;  %v820_v49 = vld.sshfl [vmem:[#allocation1 + $0x10] sm:$0xff pattern:$0x75316420]  ;;  %815 = vst [vmem:[#allocation1 + $0x1] ss:$2 sm:$0xff] %v695_v18 }
 0x3d9   : > { %1548 = vrot.lane.b32.xlu1 %v1547_v43, %s1689_s14  ;;  %839 = vst [vmem:[#allocation1 + $0x10] ss:$2 sm:$0xff] %v749_v24 }
 0x3df   : > { %v818_v50 = vld.sshfl [vmem:[#allocation1] sm:$0xff pattern:$0x75316420]  ;;  %v819_v53 = vld.sshfl [vmem:[#allocation1 + $0x8] sm:$0xff pattern:$0x75316420] }
 0x3e0   : > { %v842_v54 = vld.sshfl [vmem:[#allocation1 + $0x10] sm:$0xff pattern:$0x75316420]  ;;  %837 = vst [vmem:[#allocation1] ss:$2 sm:$0xff] %v695_v18  ;;  %v1557_v55 = vpack.i.bf16 %v819_v53, %v818_v50 }
 0x3e1   : > { %847 = vrot.lane.b32.xlu0 %v842_v54, %s1691_s16  ;;  %862 = vst [vmem:[#allocation1 + $0x11] ss:$2 sm:$0xff] %v793_v34  ;;  %802 = vrot.lane.b32.xlu1 %v799_v48, %s1690_s15 }
 0x3e7   : > { %v840_v45 = vld.sshfl [vmem:[#allocation1] sm:$0xff pattern:$0x75316420]  ;;  %v841_v56 = vld.sshfl [vmem:[#allocation1 + $0x8] sm:$0xff pattern:$0x75316420] }
 0x3e8   : > { %v865_v57 = vld.sshfl [vmem:[#allocation1 + $0x10] sm:$0xff pattern:$0x75316420]  ;;  %860 = vst [vmem:[#allocation1 + $0x1] ss:$2 sm:$0xff] %v695_v18  ;;  %v1552_v51 = vpack.i.bf16 %v841_v56, %v840_v45 }
 0x3e9   : > { %870 = vrot.lane.b32.xlu1 %v865_v57, %s1692_s17  ;;  %1558 = vrot.lane.b32.xlu0 %v1557_v55, %s1693_s23 }
 0x3ef   : > { %v863_v52 = vld.sshfl [vmem:[#allocation1] sm:$0xff pattern:$0x75316420]  ;;  %v864_v58 = vld.sshfl [vmem:[#allocation1 + $0x8] sm:$0xff pattern:$0x75316420] }
 0x3f0   : > { %v1562_v59 = vpack.i.bf16 %v864_v58, %v863_v52 }
 0x3f1   : > { %1553 = vrot.lane.b32.xlu1 %v1552_v51, %s1691_s16 }
 0x3f2   : > { %1563 = vrot.lane.b32.xlu2 %v1562_v59, %s1692_s17 }
 0x3f9   : > { %718 = vrot.lane.b32.xlu1 %v1962_v20, %s1687_s12 }
 0x3fa   : > { %825 = vrot.lane.b32.xlu2 %v820_v49, %s1693_s23 }
 0x401   : > { %886 = vperm.xlu1 %1530, %v1423_v46  }
 0x413   : > { %v741_v60 = vpop.permute.xlu2 %740 }
 0x41b   : > { %v1989_v47 = vpop.permute.xlu2 %1533 }
 0x41c   : > { %v1536_v41 = vunpack.i.h.bf16 %v1989_v47  ;;  %v1535_v42 = vunpack.i.l.bf16 %v1989_v47 }
 0x423   : > { %v763_v61 = vpop.permute.xlu2 %762 }
 0x432   : > { %v805_v1 = vpop.permute.xlu2 %804 }
 0x434   : > { %v1539_v0 = vpop.permute.xlu0 %1538 }
 0x435   : > { %v1541_v29 = vunpack.i.h.bf16 %v1539_v0  ;;  %v1540_v30 = vunpack.i.l.bf16 %v1539_v0 }
 0x43c   : > { %v785_v4 = vpop.permute.xlu0 %784 }
 0x443   : > { %v807_v9 = vpop.permute.xlu1 %806 }
 0x444   : > { %v809_v2 = vsel %vm399_vm6, %v805_v1, %v807_v9  ;;  %v1544_v13 = vpop.permute.xlu0 %1543 }
 0x445   : > { %v813_v5 = vsel %vm1837_vm10, %v809_v2, 0.0  ;;  %v1546_v31 = vunpack.i.h.bf16 %v1544_v13  ;;  %v1545_v32 = vunpack.i.l.bf16 %v1544_v13 }
 0x446   : > { %1426 = vmatpush.msk.msra.mxu3 %vm471_vm9, %v813_v5 }
 0x447   : > { %v764_v37 = vsel %vm2237_vm2, %v1545_v32, %v1546_v31  ;;  %v765_v38 = vsel %vm2238_vm1, %v1546_v31, %v763_v61  ;;  %vm2244_vm1 = vcmask 1039360   ;;  %v1428_v31 = vld [vmem:[%s2209_s3 + $0x4] sm:$0xf] }
 0x448   : > { %v768_v44 = vsel %vm1833_vm8, %v764_v37, 0.0  ;;  %v769_v48 = vsel %vm1837_vm10, %v765_v38, 0.0 }
 0x449   : > { %v855_v56 = vrot.slane %v768_v44, 4  ;;  %v856_v57 = vrot.slane %v769_v48, 4 }
 0x44b   : > { %v1549_v6 = vpop.permute.xlu1 %1548 }
 0x44c   : > { %v1564_v7 = vpop.permute.xlu2 %1563  ;;  %v1551_v14 = vunpack.i.h.bf16 %v1549_v6  ;;  %v1550_v15 = vunpack.i.l.bf16 %v1549_v6 }
 0x44d   : > { %v1566_v10 = vunpack.i.h.bf16 %v1564_v7  ;;  %v1565_v16 = vunpack.i.l.bf16 %v1564_v7 }
 0x44e   : > { %v786_v18 = vsel %vm2233_vm7, %v1550_v15, %v1551_v14  ;;  %v787_v28 = vsel %vm2235_vm14, %v1551_v14, %v785_v4  ;;  %vm2239_vm7 = vcmask 916480   ;;  %vm2241_vm14 = vcmask 908288   ;;  %v1422_v4 = vld [vmem:[%s2207_s1 + $0x4] sm:$0xf] }
 0x44f   : > { %v872_v23 = vsel %vm2234_vm11, %v1565_v16, %v1566_v10  ;;  %v790_v25 = vsel %vm1850_vm12, %v786_v18, 0.0  ;;  %v791_v35 = vsel %vm1862_vm13, %v787_v28, 0.0  ;;  %v742_v39 = vsel %vm2239_vm7, %v1540_v30, %v1541_v29  ;;  %vm2243_vm2 = vmmov %vm2239_vm7 }
 0x450   : > { %v882_v27 = vsel %vm471_vm9, %v790_v25, %v872_v23  ;;  %v746_v49 = vsel %vm1850_vm12, %v742_v39, 0.0  ;;  %vm2240_vm11 = vcmask 1031168   ;;  %v743_v46 = vsel %vm2243_vm2, %v1541_v29, %v741_v60 }
 0x451   : > { %v720_v51 = vsel %vm2240_vm11, %v1535_v42, %v1536_v41  ;;  %v833_v52 = vrot.slane %v746_v49, 4  ;;  %v747_v2 = vsel %vm1862_vm13, %v743_v46, 0.0  ;;  %v702_v60 = vsel %vm1850_vm12, %v1964_v21, 0.0  ;;  %vm2245_vm7 = vmmov %vm2240_vm11 }
 0x452   : > { %v724_v0 = vsel %vm1833_vm8, %v720_v51, 0.0  ;;  %v834_v14 = vrot.slane %v747_v2, 4  ;;  %vm2246_vm11 = vcmask 293888   ;;  %v703_v16 = vsel %vm1862_vm13, %v1966_v22, 0.0 }
 0x453   : > { %v803_v17 = vpop.permute.xlu1 %802  ;;  %v848_v26 = vpop.permute.xlu0 %847  ;;  %v878_v9 = vsel %vm471_vm9, %v724_v0, %v833_v52  ;;  %vm2249_vm2 = vcmask 1043458  }
 0x454   : > { %v808_v20 = vsel %vm399_vm6, %v803_v17, %v805_v1  ;;  %v826_v7 = vpop.permute.xlu2 %825 }
 0x455   : > { %v812_v24 = vsel %vm1833_vm8, %v808_v20, 0.0 }
 0x456   : > { %1424 = vmatpush.msk.msra.mxu2 %vm471_vm9, %v812_v24 }
 0x458   : > { %910 = vmatpush.msra.mxu2 %v882_v27 }
 0x45b   : > { %v871_v33 = vpop.permute.xlu1 %870  ;;  %v1559_v43 = vpop.permute.xlu0 %1558 }
 0x45c   : > { %v873_v34 = vsel %vm2236_vm0, %v1566_v10, %v871_v33  ;;  %v1561_v53 = vunpack.i.h.bf16 %v1559_v43  ;;  %v1560_v54 = vunpack.i.l.bf16 %v1559_v43  ;;  %vm2242_vm0 = vmmov %vm2241_vm14 }
 0x45d   : > { %v883_v36 = vsel %vm471_vm9, %v791_v35, %v873_v34 }
 0x45e   : > { %930 = vmatpush.msra.mxu3 %v883_v36  ;;  %v827_v1 = vsel %vm2244_vm1, %v1560_v54, %v1561_v53 }
 0x45f   : > { %v876_v6 = vsel %vm471_vm9, %v702_v60, %v827_v1 }
 0x463   : > { %v1554_v50 = vpop.permute.xlu1 %1553 }
 0x464   : > { %v1556_v55 = vunpack.i.h.bf16 %v1554_v50  ;;  %v1555_v45 = vunpack.i.l.bf16 %v1554_v50 }
 0x466   : > { %v849_v58 = vsel %vm2241_vm14, %v1555_v45, %v1556_v55  ;;  %v850_v59 = vsel %vm2242_vm0, %v1556_v55, %v848_v26  ;;  %vm2247_vm14 = vmmov %vm2244_vm1 }
 0x467   : > { %v880_v47 = vsel %vm471_vm9, %v849_v58, %v855_v56  ;;  %v881_v61 = vsel %vm471_vm9, %v850_v59, %v856_v57  ;;  %v828_v10 = vsel %vm2247_vm14, %v1561_v53, %v826_v7  ;;  %vm2248_vm0 = vmmov %vm2246_vm11 }
 0x468   : > { %911 = vmatpush.msra.mxu2 %v880_v47  ;;  %931 = vmatpush.msra.mxu3 %v881_v61  ;;  %v877_v17 = vsel %vm471_vm9, %v703_v16, %v828_v10  ;;  %vm2250_vm1 = vmmov %vm2249_vm2 }
 0x46a   : > { %912 = vmatpush.msra.mxu2 %v878_v9 }
 0x46b   : > { %v719_v5 = vpop.permute.xlu1 %718 }
 0x46c   : > { %v721_v13 = vsel %vm2245_vm7, %v1536_v41, %v719_v5  ;;  %913 = vmatpush.msra.mxu2 %v876_v6  ;;  %vm2251_vm7 = vmmov %vm2250_vm1 }
 0x46d   : > { %1425 = vmatmul.msk.f32.vlgmr.msra.gmra.mxu2 %vm2246_vm11, %v1422_v4  ;;  %v725_v15 = vsel %vm1837_vm10, %v721_v13, 0.0  ;;  %vm2252_vm11 = vmmov %vm2250_vm1 }
 0x46e   : > { %v879_v21 = vsel %vm471_vm9, %v725_v15, %v834_v14 }
 0x46f   : > { %932 = vmatpush.msra.mxu3 %v879_v21 }
 0x471   : > { %933 = vmatpush.msra.mxu3 %v877_v17 }
 0x472   : > { %1427 = vmatmul.msk.f32.vlgmr.msra.gmra.mxu3 %vm2248_vm0, %v1422_v4  ;;  %v1429_v4 = vld [vmem:[%s2210_s4 + $0x4] sm:$0xf] }
 0x473   : > { %v887_v20 = vpop.permute.xlu1 %886 }
 0x4f0   : > { %v915_v18 = vpop.f32.mrf.mxu2 }
 0x4f1   : > { %v916_v23 = vadd.f32 %v915_v18, %v887_v20 }
 0x4f3   : > { %v985_v26 = vsel %vm2249_vm2, %v916_v23, 0.0  ;;  %v942_v28 = vsel %vm537_vm15, %v916_v23, 0.0 }
 0x4f5   : > { %v935_v24 = vpop.f32.mrf.mxu3 }
 0x4f6   : > { %v936_v25 = vadd.f32 %v935_v24, %v887_v20 }
 0x4f8   : > { %v986_v27 = vsel %vm2250_vm1, %v936_v25, 0.0  ;;  %v943_v29 = vsel %vm537_vm15, %v936_v25, 0.0 }
 0x4f9   : > { %v987_v30 = vadd.f32 %v986_v27, %v985_v26  ;;  %v944_v22 = vadd.f32 %v943_v29, %v942_v28 }
 0x4fb   : > { %988 = vadd.xlane.f32.xlu0 %v987_v30  ;;  %945 = vadd.xlane.f32.xlu2 %v944_v22 }
 0x513   : > { %1038 = vperm.xlu2 %1531, %v1428_v31  }
 0x56e   : > { %v989_v32 = vpop.xlane.xlu0 %988  ;;  %v946_v33 = vpop.xlane.xlu2 %945 }
 0x56f   : > { %v991_v34 = vrot.slane %v989_v32, 2  ;;  %v947_v35 = vsel %vm537_vm15, %v946_v33, 0.0 }
 0x570   : > { %v948_v36 = vrot.slane %v947_v35, 4 }
 0x571   : > { %v993_v37 = vsel %vm537_vm15, %v991_v34, 0.0 }
 0x572   : > { %v994_v38 = vrot.slane %v993_v37, 4  ;;  %v949_v39 = vadd.f32 %v948_v36, %v947_v35 }
 0x574   : > { %v995_v41 = vadd.f32 %v994_v38, %v993_v37  ;;  %v950_v42 = vrot.slane %v949_v39, 2 }
 0x576   : > { %v996_v43 = vrot.slane %v995_v41, 2  ;;  %v951_v44 = vadd.f32 %v950_v42, %v949_v39 }
 0x578   : > { %v997_v48 = vadd.f32 %v996_v43, %v995_v41  ;;  %v952_v49 = vrot.slane %v951_v44, 1 }
 0x57a   : > { %v998_v50 = vrot.slane %v997_v48, 1  ;;  %v953_v53 = vadd.f32 %v952_v49, %v951_v44 }
 0x57c   : > { %v999_v54 = vadd.f32 %v998_v50, %v997_v48  ;;  %v954_v55 = vmul.f32 %v953_v53, %v1923_v40 }
 0x57e   : > { %v2060_v45 = vsub.f32 %v916_v23, %v954_v55  ;;  %v2062_v56 = vsub.f32 %v936_v25, %v954_v55  ;;  %v1000_v57 = vmul.f32 %v999_v54, %v1923_v40  ;;  %v1039_v54 = vpop.permute.xlu2 %1038 }
 0x580   : > { %v957_v51 = vmul.f32 %v2060_v45, %v2060_v45  ;;  %v958_v52 = vmul.f32 %v2062_v56, %v2062_v56  ;;  %v1001_v58 = vsub.f32 %v916_v23, %v1000_v57  ;;  %v1002_v59 = vsub.f32 %v936_v25, %v1000_v57 }
 0x582   : > { %v959_v46 = vsel %vm537_vm15, %v957_v51, 0.0  ;;  %v960_v47 = vsel %vm537_vm15, %v958_v52, 0.0  ;;  %v1003_v61 = vmul.f32 %v1001_v58, %v1001_v58  ;;  %v1004_v0 = vmul.f32 %v1002_v59, %v1002_v59 }
 0x583   : > { %v961_v1 = vadd.f32 %v960_v47, %v959_v46 }
 0x584   : > { %v1005_v9 = vsel %vm2251_vm7, %v1003_v61, 0.0  ;;  %v1006_v2 = vsel %vm2252_vm11, %v1004_v0, 0.0 }
 0x585   : > { %962 = vadd.xlane.f32.xlu0 %v961_v1  ;;  %v1007_v60 = vadd.f32 %v1006_v2, %v1005_v9 }
 0x587   : > { %1008 = vadd.xlane.f32.xlu1 %v1007_v60 }
 0x5a0   : > { %1045 = vperm.xlu1 %1530, %v1429_v4  }
 0x5f8   : > { %v963_v5 = vpop.xlane.xlu0 %962 }
 0x5f9   : > { %v964_v6 = vsel %vm537_vm15, %v963_v5, 0.0 }
 0x5fa   : > { %v965_v7 = vrot.slane %v964_v6, 4  ;;  %v1009_v13 = vpop.xlane.xlu1 %1008 }
 0x5fb   : > { %v1011_v14 = vrot.slane %v1009_v13, 2 }
 0x5fc   : > { %v966_v15 = vadd.f32 %v965_v7, %v964_v6 }
 0x5fd   : > { %v1013_v10 = vsel %vm537_vm15, %v1011_v14, 0.0 }
 0x5fe   : > { %v967_v21 = vrot.slane %v966_v15, 2  ;;  %v1014_v16 = vrot.slane %v1013_v10, 4 }
 0x600   : > { %v968_v17 = vadd.f32 %v967_v21, %v966_v15  ;;  %v1015_v18 = vadd.f32 %v1014_v16, %v1013_v10 }
 0x602   : > { %v969_v20 = vrot.slane %v968_v17, 1  ;;  %v1016_v23 = vrot.slane %v1015_v18, 2 }
 0x604   : > { %v970_v24 = vadd.f32 %v969_v20, %v968_v17  ;;  %v1017_v25 = vadd.f32 %v1016_v23, %v1015_v18 }
 0x606   : > { %v971_v26 = vmul.f32 %v970_v24, %v1923_v40  ;;  %v1018_v27 = vrot.slane %v1017_v25, 1 }
 0x608   : > { %v972_v28 = vadd.f32 1e-05, %v971_v26  ;;  %v1019_v29 = vadd.f32 %v1018_v27, %v1017_v25 }
 0x60a   : > { %1612 = vrsqrt.f32 %v972_v28  ;;  %v1020_v30 = vmul.f32 %v1019_v29, %v1923_v40  ;;  %vm979_vm0 = vweird.f32 %v972_v28 }
 0x60c   : > { %v1021_v22 = vadd.f32 1e-05, %v1020_v30 }
 0x60e   : > { %1614 = vrsqrt.f32 %v1021_v22  ;;  %vm1028_vm7 = vweird.f32 %v1021_v22 }
 0x610   : > { %v1613_v31 = vpop.eup %1612 }
 0x611   : > { %v974_v32 = vmul.f32 %v1613_v31, %v972_v28  ;;  %vm980_vm14 = vweird.f32 %v1613_v31 }
 0x612   : > { %vm981_vm1 = vmor %vm979_vm0, %vm980_vm14  ;;  %v1046_v46 = vpop.permute.xlu1 %1045  ;;  %vm2259_vm0 = vcmask 1031168  }
 0x613   : > { %v975_v33 = vmul.f32 %v1613_v31, %v974_v32 }
 0x614   : > { %v1615_v34 = vpop.eup %1614 }
 0x615   : > { %v976_v35 = vmul.f32 0.5, %v975_v33  ;;  %v1023_v36 = vmul.f32 %v1615_v34, %v1021_v22  ;;  %vm1029_vm2 = vweird.f32 %v1615_v34 }
 0x616   : > { %vm1030_vm11 = vmor %vm1028_vm7, %vm1029_vm2  ;;  %vm2260_vm2 = vcmask 908288   ;;  %vm2262_vm7 = vcmask 777216  }
 0x617   : > { %v977_v37 = vsub.f32 1.5, %v976_v35  ;;  %v1024_v38 = vmul.f32 %v1615_v34, %v1023_v36 }
 0x619   : > { %v1025_v39 = vmul.f32 0.5, %v1024_v38  ;;  %v978_v41 = vmul.f32 %v1613_v31, %v977_v37 }
 0x61b   : > { %v1026_v42 = vsub.f32 1.5, %v1025_v39  ;;  %v982_v40 = vsel %vm981_vm1, %v1613_v31, %v978_v41  ;;  %vm2261_vm1 = vmmov %vm2260_vm2 }
 0x61c   : > { %v983_v50 = vmul.f32 %v982_v40, %v2060_v45  ;;  %v984_v53 = vmul.f32 %v982_v40, %v2062_v56 }
 0x61d   : > { %v1027_v43 = vmul.f32 %v1615_v34, %v1026_v42 }
 0x61f   : > { %v1031_v44 = vsel %vm1030_vm11, %v1615_v34, %v1027_v43  ;;  %vm2263_vm11 = vmmov %vm2262_vm7 }
 0x620   : > { %v1032_v48 = vmul.f32 %v1031_v44, %v1001_v58  ;;  %v1033_v49 = vmul.f32 %v1031_v44, %v1002_v59 }
 0x622   : > { %v1034_v55 = vsel %vm537_vm15, %v983_v50, %v1032_v48  ;;  %v1035_v57 = vsel %vm537_vm15, %v984_v53, %v1033_v49 }
 0x623   : > { %v1041_v51 = vmul.f32 %v1039_v54, %v1034_v55  ;;  %v1042_v52 = vmul.f32 %v1039_v54, %v1035_v57 }
 0x625   : > { %v1048_v47 = vadd.f32 %v1046_v46, %v1041_v51  ;;  %v1049_v61 = vadd.f32 %v1046_v46, %v1042_v52 }
 0x627   : > { %v1050_v0 = vadd.f32 %v1048_v47, %v1952_v12  ;;  %v1051_v1 = vadd.f32 %v1049_v61, %v1950_v8 }
 0x629   : > { %v1054_v58 = vmul.f32 0.044715, %v1050_v0  ;;  %v1055_v59 = vmul.f32 0.044715, %v1051_v1  ;;  %v1053_v14 = vmul.f32 0.5, %v1051_v1  ;;  %v1052_v12 = vmul.f32 0.5, %v1050_v0 }
 0x62b   : > { %v1056_v9 = vmul.f32 %v1054_v58, %v1050_v0  ;;  %v1057_v45 = vmul.f32 %v1055_v59, %v1051_v1 }
 0x62d   : > { %v1058_v2 = vmul.f32 %v1056_v9, %v1050_v0  ;;  %v1059_v56 = vmul.f32 %v1057_v45, %v1051_v1  ;;  %v1431_v9 = vld [vmem:[%s2208_s2 + $0x8] sm:$0xf] }
 0x62f   : > { %v1060_v60 = vadd.f32 %v1058_v2, %v1050_v0  ;;  %v1061_v4 = vadd.f32 %v1059_v56, %v1051_v1 }
 0x631   : > { %v1062_v5 = vmul.f32 0.7978846, %v1060_v60  ;;  %v1063_v6 = vmul.f32 0.7978846, %v1061_v4 }
 0x633   : > { %1616 = vtanh.f32 %v1062_v5 }
 0x634   : > { %1618 = vtanh.f32 %v1063_v6 }
 0x639   : > { %v1617_v7 = vpop.eup %1616 }
 0x63a   : > { %v1619_v13 = vpop.eup %1618  ;;  %v1066_v15 = vadd.f32 1.0, %v1617_v7 }
 0x63b   : > { %v1067_v10 = vadd.f32 1.0, %v1619_v13 }
 0x63c   : > { %v1068_v8 = vmul.f32 %v1066_v15, %v1052_v12 }
 0x63d   : > { %v1069_v21 = vmul.f32 %v1067_v10, %v1053_v14 }
 0x63f   : > { %v1076_v16 = vrot.slane %v1069_v21, 4 }
 0x641   : > { %v1077_v17 = vsel %vm471_vm9, %v1068_v8, %v1076_v16 }
 0x642   : > { %1078 = vrot.lane.b32.xlu0 %v1077_v17, %s1685_s10 }
 0x6b4   : > { %v1079_v18 = vpop.permute.xlu0 %1078 }
 0x6b5   : > { %v1080_v20 = vrot.slane %v1079_v18, 4 }
 0x6b7   : > { %v1081_v23 = vsel %vm264_vm3, %v1080_v20, %v1079_v18  ;;  %1085 = vst.msk [vmem:[#allocation2 + $0x8] sm:$0xf] %vm272_vm4, %v1080_v20  ;;  %vm2253_vm3 = vcmask 916480   ;;  %vm2254_vm4 = vcmask 900096  }
 0x6b8   : > { %1084 = vst.msk [vmem:[#allocation2] sm:$0xff] %vm1783_vm5, %v1081_v23  ;;  %vm2255_vm5 = vmmov %vm2254_vm4 }
 0x6b9   : > { %vm2258_vm14 = vmmov %vm2253_vm3 }
 0x6be   : > { %v1096_v24 = vld [vmem:[#allocation2 + $0x8] sm:$0xf] }
 0x6bf   : > { %v1086_v25 = vld [vmem:[#allocation2] sm:$0xff]  ;;  %1101 = vst [vmem:[#allocation1 + $0x10] ss:$2 sm:$0xff] %v1096_v24  ;;  %v1118_v26 = vld [vmem:[#allocation2 + $0x8] sm:$0xf] }
 0x6c0   : > { %1088 = vst [vmem:[#allocation1] ss:$2 sm:$0xff] %v1086_v25  ;;  %v1140_v30 = vld [vmem:[#allocation2 + $0x8] sm:$0xf] }
 0x6c1   : > { %v1162_v3 = vld [vmem:[#allocation2 + $0x8] sm:$0xf] }
 0x6c2   : > { %v1184_v38 = vld [vmem:[#allocation2 + $0x8] sm:$0xf] }
 0x6c6   : > { %v1104_v29 = vld.sshfl [vmem:[#allocation1 + $0x10] sm:$0xff pattern:$0x75316420] }
 0x6c7   : > { %v2092_v27 = vld.sshfl [vmem:[#allocation1] sm:$0xff pattern:$0x75316420]  ;;  %v2094_v28 = vld.sshfl [vmem:[#allocation1 + $0x8] sm:$0xff pattern:$0x75316420] }
 0x6c8   : > { %1099 = vst [vmem:[#allocation1] ss:$2 sm:$0xff] %v1086_v25  ;;  %v1093_v19 = vsel %vm1850_vm12, %v2092_v27, 0.0 }
 0x6c9   : > { %1123 = vst [vmem:[#allocation1 + $0x10] ss:$2 sm:$0xff] %v1118_v26 }
 0x6cf   : > { %v1102_v22 = vld.sshfl [vmem:[#allocation1] sm:$0xff pattern:$0x75316420]  ;;  %v1103_v31 = vld.sshfl [vmem:[#allocation1 + $0x8] sm:$0xff pattern:$0x75316420] }
 0x6d0   : > { %1121 = vst [vmem:[#allocation1] ss:$2 sm:$0xff] %v1086_v25  ;;  %v1567_v32 = vpack.i.bf16 %v1104_v29, %v1103_v31  ;;  %v1126_v33 = vld.sshfl [vmem:[#allocation1 + $0x10] sm:$0xff pattern:$0x75316420] }
 0x6d1   : > { %1145 = vst [vmem:[#allocation1 + $0x10] ss:$2 sm:$0xff] %v1140_v30 }
 0x6d2   : > { %1568 = vrot.lane.b32.xlu1 %v1567_v32, %s1687_s12 }
 0x6d7   : > { %v1124_v34 = vld.sshfl [vmem:[#allocation1] sm:$0xff pattern:$0x75316420]  ;;  %v1125_v35 = vld.sshfl [vmem:[#allocation1 + $0x8] sm:$0xff pattern:$0x75316420] }
 0x6d8   : > { %1143 = vst [vmem:[#allocation1] ss:$2 sm:$0xff] %v1086_v25  ;;  %v1572_v36 = vpack.i.bf16 %v1126_v33, %v1125_v35  ;;  %v1148_v37 = vld.sshfl [vmem:[#allocation1 + $0x10] sm:$0xff pattern:$0x75316420] }
 0x6d9   : > { %1167 = vst [vmem:[#allocation1 + $0x10] ss:$2 sm:$0xff] %v1162_v3 }
 0x6da   : > { %1573 = vrot.lane.b32.xlu2 %v1572_v36, %s1686_s11 }
 0x6df   : > { %v1146_v39 = vld.sshfl [vmem:[#allocation1] sm:$0xff pattern:$0x75316420]  ;;  %v1147_v41 = vld.sshfl [vmem:[#allocation1 + $0x8] sm:$0xff pattern:$0x75316420] }
 0x6e0   : > { %1165 = vst [vmem:[#allocation1] ss:$2 sm:$0xff] %v1086_v25  ;;  %1149 = vrot.lane.b32.xlu0 %v1146_v39, %s1688_s13  ;;  %v1170_v42 = vld.sshfl [vmem:[#allocation1 + $0x10] sm:$0xff pattern:$0x75316420]  ;;  %v1577_v43 = vpack.i.bf16 %v1148_v37, %v1147_v41 }
 0x6e1   : > { %1189 = vst [vmem:[#allocation1 + $0x10] ss:$2 sm:$0xff] %v1184_v38 }
 0x6e2   : > { %1127 = vrot.lane.b32.xlu2 %v1124_v34, %s1686_s11  ;;  %1578 = vrot.lane.b32.xlu1 %v1577_v43, %s1688_s13  ;;  %s1640_s11 = scalar_lea.hbm %s2211_s5, 16 }
 0x6e7   : > { %v1168_v40 = vld.sshfl [vmem:[#allocation1] sm:$0xff pattern:$0x75316420]  ;;  %v1169_v44 = vld.sshfl [vmem:[#allocation1 + $0x8] sm:$0xff pattern:$0x75316420] }
 0x6e8   : > { %1187 = vst [vmem:[#allocation1] ss:$2 sm:$0xff] %v1086_v25  ;;  %v1192_v48 = vld.sshfl [vmem:[#allocation1 + $0x10] sm:$0xff pattern:$0x75316420]  ;;  %v1582_v49 = vpack.i.bf16 %v1170_v42, %v1169_v44 }
 0x6e9   : > { %1208 = vst [vmem:[#allocation1 + $0x11] ss:$2 sm:$0xff] %v1096_v24  ;;  %1197 = vrot.lane.b32.xlu0 %v1192_v48, %s1690_s15 }
 0x6ea   : > { %1583 = vrot.lane.b32.xlu2 %v1582_v49, %s1689_s14  ;;  %1171 = vrot.lane.b32.xlu1 %v1168_v40, %s1689_s14  ;;  %s215_s14 = sand.u32 1, %s1674_s19  }
 0x6ef   : > { %v1190_v50 = vld.sshfl [vmem:[#allocation1] sm:$0xff pattern:$0x75316420]  ;;  %v1191_v53 = vld.sshfl [vmem:[#allocation1 + $0x8] sm:$0xff pattern:$0x75316420] }
 0x6f0   : > { %1206 = vst [vmem:[#allocation1 + $0x1] ss:$2 sm:$0xff] %v1086_v25  ;;  %v1211_v54 = vld.sshfl [vmem:[#allocation1 + $0x10] sm:$0xff pattern:$0x75316420] }
 0x6f1   : > { %1230 = vst [vmem:[#allocation1 + $0x10] ss:$2 sm:$0xff] %v1140_v30  ;;  %1193 = vrot.lane.b32.xlu0 %v1190_v50, %s1690_s15 }
 0x6f2   : > { %1195 = vrot.lane.b32.xlu2 %v1191_v53, %s1690_s15  ;;  %s1415_s15 = sshll.u32 %s215_s14, 3 }
 0x6f3   : > { %s217_s6 = scalar_lea.vmem [#allocation3], %s1415_s15 }
 0x6f4   : > { %s1349_s7 = sshll.u32 %s217_s6, 4  ;;  %s1350_s7 = int_to_ptr.vmem [resolvable:$true] %s1349_s7 }
 0x6f7   : > { %v1209_v55 = vld.sshfl [vmem:[#allocation1] sm:$0xff pattern:$0x75316420]  ;;  %v1210_v57 = vld.sshfl [vmem:[#allocation1 + $0x8] sm:$0xff pattern:$0x75316420] }
 0x6f8   : > { %1228 = vst [vmem:[#allocation1] ss:$2 sm:$0xff] %v1086_v25  ;;  %v1233_v51 = vld.sshfl [vmem:[#allocation1 + $0x10] sm:$0xff pattern:$0x75316420]  ;;  %v1597_v58 = vpack.i.bf16 %v1211_v54, %v1210_v57 }
 0x6f9   : > { %1253 = vst [vmem:[#allocation1 + $0x11] ss:$2 sm:$0xff] %v1184_v38 }
 0x6ff   : > { %v1231_v52 = vld.sshfl [vmem:[#allocation1] sm:$0xff pattern:$0x75316420]  ;;  %v1232_v46 = vld.sshfl [vmem:[#allocation1 + $0x8] sm:$0xff pattern:$0x75316420] }
 0x700   : > { %1234 = vrot.lane.b32.xlu0 %v1231_v52, %s1691_s16  ;;  %v1587_v47 = vpack.i.bf16 %v1233_v51, %v1232_v46  ;;  %1251 = vst [vmem:[#allocation1 + $0x1] ss:$2 sm:$0xff] %v1086_v25  ;;  %v1256_v61 = vld.sshfl [vmem:[#allocation1 + $0x10] sm:$0xff pattern:$0x75316420] }
 0x702   : > { %1588 = vrot.lane.b32.xlu2 %v1587_v47, %s1691_s16  ;;  %s1442_s16 = sshll.u32 %s1747_s22, 3  ;;  %s1336_s22 = scalar_lea.sflag [#allocation4], %s215_s14 }
 0x703   : > { %s1347_s30 = scalar_lea.hbm %s2211_s5, %s1442_s16 }
 0x704   : > { %s1351_s8 = sshll.u32 %s1347_s30, 4  ;;  %s1352_s8 = int_to_ptr.hbm [resolvable:$true] %s1351_s8 }
 0x705   : > { %s1634_s9 = sshra.s32 %s1352_s8, 4  ;;  %s1635_s9 = int_to_ptr.hbm [resolvable:$true] %s1634_s9 }
 0x706   : > { %s1636_s25 = scalar_lea.hbm %s1635_s9, 8  ;;  %p1641_p0 = scmp.lt.s32.totalorder %s1635_s9, %s2211_s5 }
 0x707   : > { %v1254_v0 = vld.sshfl [vmem:[#allocation1] sm:$0xff pattern:$0x75316420]  ;;  %v1255_v1 = vld.sshfl [vmem:[#allocation1 + $0x8] sm:$0xff pattern:$0x75316420]  ;;  %p1637_p11 = scmp.ne.s32.totalorder %s1635_s9, %s1636_s25  ;;  %p1642_p1 = scmp.lt.s32.totalorder %s1640_s11, %s1636_s25 }
 0x708   : > { %1257 = vrot.lane.b32.xlu0 %v1254_v0, %s1692_s17  ;;  %v1592_v59 = vpack.i.bf16 %v1256_v61, %v1255_v1 }
 0x709   : > { %p1638_p12 = pnand %p1637_p11, %p1764_p5  ;;  %p1643_p2 = por %p1642_p1, %p1641_p0 }
 0x70a   : > { %1598 = vrot.lane.b32.xlu2 %v1597_v58, %s1693_s23  ;;  %1593 = vrot.lane.b32.xlu1 %v1592_v59, %s1692_s17 }
 0x70b   : > { %p1639_p13 = pneg %p1638_p12 }
 0x70d   : > { %p1644_p3 = pnand %p1643_p2, %p1639_p13 }
 0x710   : > { %1212 = vrot.lane.b32.xlu0 %v1209_v55, %s1693_s23 }
 0x712   : > { %1105 = vrot.lane.b32.xlu1 %v1102_v22, %s1687_s12 }
 0x71a   : > { %1277 = vperm.xlu1 %1530, %v1431_v9  }
 0x734   : > { %v1574_v45 = vpop.permute.xlu2 %1573 }
 0x735   : > { %v1576_v17 = vunpack.i.h.bf16 %v1574_v45  ;;  %v1575_v18 = vunpack.i.l.bf16 %v1574_v45 }
 0x737   : > { %v1134_v30 = vsel %vm2253_vm3, %v1575_v18, %v1576_v17  ;;  %vm2264_vm3 = vcmask 1039360  }
 0x738   : > { %v1138_v41 = vsel %vm1862_vm13, %v1134_v30, 0.0 }
 0x739   : > { %v1225_v9 = vrot.slane %v1138_v41, 4 }
 0x73c   : > { %v1128_v2 = vpop.permute.xlu2 %1127 }
 0x73d   : > { %v1133_v37 = vsel %vm2258_vm14, %v1128_v2, %v1575_v18 }
 0x73e   : > { %v1137_v1 = vsel %vm1850_vm12, %v1133_v37, 0.0 }
 0x744   : > { %v1584_v56 = vpop.permute.xlu2 %1583  ;;  %v1569_v13 = vpop.permute.xlu1 %1568 }
 0x745   : > { %v1586_v24 = vunpack.i.h.bf16 %v1584_v56  ;;  %v1585_v25 = vunpack.i.l.bf16 %v1584_v56  ;;  %v1571_v26 = vunpack.i.h.bf16 %v1569_v13  ;;  %v1570_v29 = vunpack.i.l.bf16 %v1569_v13 }
 0x747   : > { %v1112_v39 = vsel %vm2259_vm0, %v1570_v29, %v1571_v26 }
 0x748   : > { %v1116_v0 = vsel %vm1837_vm10, %v1112_v39, 0.0 }
 0x74c   : > { %v1196_v4 = vpop.permute.xlu2 %1195 }
 0x752   : > { %v1150_v60 = vpop.permute.xlu0 %1149 }
 0x754   : > { %v1579_v12 = vpop.permute.xlu1 %1578 }
 0x755   : > { %v1581_v20 = vunpack.i.h.bf16 %v1579_v12  ;;  %v1580_v23 = vunpack.i.l.bf16 %v1579_v12 }
 0x757   : > { %v1155_v33 = vsel %vm2254_vm4, %v1150_v60, %v1580_v23  ;;  %v1156_v3 = vsel %vm2255_vm5, %v1580_v23, %v1581_v20  ;;  %v1270_v60 = vsel %vm471_vm9, %v1116_v0, %v1225_v9  ;;  %vm2265_vm4 = vmmov %vm2259_vm0  ;;  %vm2267_vm5 = vcmask 293888  }
 0x758   : > { %v1159_v40 = vsel %vm1833_vm8, %v1155_v33, 0.0  ;;  %v1160_v44 = vsel %vm1837_vm10, %v1156_v3, 0.0 }
 0x759   : > { %v1246_v47 = vrot.slane %v1159_v40, 4  ;;  %v1247_v61 = vrot.slane %v1160_v44, 4 }
 0x75b   : > { %v1198_v5 = vpop.permute.xlu0 %1197 }
 0x75c   : > { %v1200_v6 = vsel %vm399_vm6, %v1196_v4, %v1198_v5  ;;  %v1589_v21 = vpop.permute.xlu2 %1588  ;;  %v1172_v16 = vpop.permute.xlu1 %1171  ;;  %v1094_v5 = vsel %vm1862_vm13, %v2094_v28, 0.0 }
 0x75d   : > { %v1204_v7 = vsel %vm1837_vm10, %v1200_v6, 0.0  ;;  %v1591_v22 = vunpack.i.h.bf16 %v1589_v21  ;;  %v1590_v31 = vunpack.i.l.bf16 %v1589_v21  ;;  %v1430_v6 = vld [vmem:[%s2207_s1 + $0x8] sm:$0xf]  ;;  %vm2266_vm10 = vmmov %vm2264_vm3 }
 0x75e   : > { %1434 = vmatpush.msk.msrb.mxu1 %vm471_vm9, %v1204_v7 }
 0x75f   : > { %v1241_v53 = vsel %vm2260_vm2, %v1590_v31, %v1591_v22 }
 0x760   : > { %v1272_v59 = vsel %vm471_vm9, %v1241_v53, %v1247_v61 }
 0x763   : > { %v1194_v14 = vpop.permute.xlu0 %1193 }
 0x764   : > { %v1199_v15 = vsel %vm399_vm6, %v1194_v14, %v1196_v4  ;;  %vm2256_vm6 = vcmask 785408   ;;  %v1599_v35 = vpop.permute.xlu2 %1598  ;;  %v1224_v4 = vrot.slane %v1137_v1, 4 }
 0x765   : > { %v1203_v10 = vsel %vm1833_vm8, %v1199_v15, 0.0  ;;  %v1177_v34 = vsel %vm2256_vm6, %v1172_v16, %v1585_v25  ;;  %vm2257_vm15 = vmmov %vm2256_vm6  ;;  %v1601_v48 = vunpack.i.h.bf16 %v1599_v35  ;;  %v1600_v54 = vunpack.i.l.bf16 %v1599_v35 }
 0x766   : > { %1432 = vmatpush.msk.msrb.mxu0 %vm471_vm9, %v1203_v10  ;;  %v1178_v36 = vsel %vm2257_vm15, %v1585_v25, %v1586_v24  ;;  %v1181_v49 = vsel %vm1850_vm12, %v1177_v34, 0.0 }
 0x767   : > { %v1182_v50 = vsel %vm1862_vm13, %v1178_v36, 0.0  ;;  %v1219_v2 = vsel %vm2264_vm3, %v1600_v54, %v1601_v48  ;;  %vm2268_vm13 = vmmov %vm2267_vm5 }
 0x768   : > { %v1268_v13 = vsel %vm471_vm9, %v1094_v5, %v1219_v2 }
 0x772   : > { %v1235_v8 = vpop.permute.xlu0 %1234 }
 0x773   : > { %v1240_v55 = vsel %vm2261_vm1, %v1235_v8, %v1590_v31 }
 0x774   : > { %v1271_v58 = vsel %vm471_vm9, %v1240_v55, %v1246_v47 }
 0x77a   : > { %v1258_v32 = vpop.permute.xlu0 %1257 }
 0x77c   : > { %v1594_v38 = vpop.permute.xlu1 %1593 }
 0x77d   : > { %v1596_v42 = vunpack.i.h.bf16 %v1594_v38  ;;  %v1595_v43 = vunpack.i.l.bf16 %v1594_v38 }
 0x77f   : > { %v1263_v57 = vsel %vm2262_vm7, %v1258_v32, %v1595_v43  ;;  %v1264_v51 = vsel %vm2263_vm11, %v1595_v43, %v1596_v42 }
 0x780   : > { %v1273_v52 = vsel %vm471_vm9, %v1181_v49, %v1263_v57  ;;  %v1274_v46 = vsel %vm471_vm9, %v1182_v50, %v1264_v51 }
 0x781   : > { %1301 = vmatpush.msrb.mxu0 %v1273_v52  ;;  %1321 = vmatpush.msrb.mxu1 %v1274_v46 }
 0x782   : > { %v1213_v45 = vpop.permute.xlu0 %1212 }
 0x783   : > { %1302 = vmatpush.msrb.mxu0 %v1271_v58  ;;  %1322 = vmatpush.msrb.mxu1 %v1272_v59  ;;  %v1218_v7 = vsel %vm2266_vm10, %v1213_v45, %v1600_v54 }
 0x784   : > { %v1106_v56 = vpop.permute.xlu1 %1105  ;;  %v1267_v28 = vsel %vm471_vm9, %v1093_v19, %v1218_v7 }
 0x785   : > { %v1111_v63 = vsel %vm2265_vm4, %v1106_v56, %v1570_v29  ;;  %1323 = vmatpush.msrb.mxu1 %v1270_v60 }
 0x786   : > { %v1115_v14 = vsel %vm1833_vm8, %v1111_v63, 0.0 }
 0x787   : > { %1324 = vmatpush.msrb.mxu1 %v1268_v13  ;;  %v1269_v15 = vsel %vm471_vm9, %v1115_v14, %v1224_v4 }
 0x788   : > { %1303 = vmatpush.msrb.mxu0 %v1269_v15  ;;  %1435 = vmatmul.msk.f32.vlgmr.msrb.gmra.mxu1 %vm2267_vm5, %v1430_v6 }
 0x78a   : > { %1304 = vmatpush.msrb.mxu0 %v1267_v28 }
 0x78b   : > { %1433 = vmatmul.msk.f32.vlgmr.msrb.gmra.mxu0 %vm2268_vm13, %v1430_v6 }
 0x78c   : > { %v1278_v62 = vpop.permute.xlu1 %1277 }
 0x805   : > { %v1326_v10 = vpop.f32.mrf.mxu1 }
 0x806   : > { %v1327_v12 = vadd.f32 %v1326_v10, %v1278_v62 }
 0x808   : > { %v1331_v11 = vrot.slane %v1327_v12, 4  ;;  %v1306_v27 = vpop.f32.mrf.mxu0 }
 0x809   : > { %v1307_v21 = vadd.f32 %v1306_v27, %v1278_v62 }
 0x80b   : > { %v1332_v8 = vsel %vm471_vm9, %v1307_v21, %v1331_v11 }
 0x80c   : > { %1334 = vst [vmem:[%s217_s6] sm:$0xff] %v1332_v8 }
 0x80d   : > { %1647 = shalt.err (!%p1644_p3)
}
 0x80e   : > { %1443 = dma.vmem_to_hbm [thread:$0]  (%p1764_p5), %s1350_s7, 128, %s1352_s8, %s1336_s22  }
 0x80f PF: > { %p1449_p4 = scmp.ge.s32.totalorder %s1682_s21, 2  ;;  %s1363_s14 = sand.u32 1, %s1670_s18  }
 0x810   : > { %s1364_s15 = scalar_lea.sflag [#allocation4], %s1363_s14 }
 0x811   : > { %p1446_p7 = pnand %p1449_p4, %p1768_p6 }
 0x813   : > { %p1447_p8 = pneg %p1446_p7 }
 0x815   : > { %1665 = dma.done.wait (%p1447_p8), %s1364_s15, 128  }
 0x816   : > { %1667 = vsyncadd (%p1447_p8), %s1364_s15, 4294967168  ;;  %p15_p9 = scmp.ge.s32.totalorder %s1751_s24, 4   ;;  %s2269_s18 = smov %s1674_s19 }
 0x817   : > { %s2270_s19 = smov %s1678_s20  ;;  %s2271_s20 = smov %s1762_s27 }
 0x818   : > { %s2272_s21 = smov %s1751_s24  ;;  %17 = sbr.rel (!%p15_p9) target bundleno = 3 (0x3), region = 111 }
 0x81d   :  { %1370 = vsyncpa [#allocation4], 1 }
 0x81e   :  { %1372 = vsyncpa [#allocation4 + $0x1], 1 }

</bundles_post_ra>
